<compile_context>
chip_gen: v6e
topology: v6e:2x2x1
jax: 0.10.0
libtpu: 0.0.40
codegen_flags: <defaults>
</compile_context>

<pallas_src>
import functools

import jax
import jax.numpy as jnp
from jax.experimental import pallas as pl
from jax.experimental.pallas import tpu as pltpu

EPS = 1e-5
_LANE = 128
_H1, _H2 = 180, 360


def _round_up(n, m):
    return ((n + m - 1) // m) * m


def _decoder_kernel(x_ref,
                    w1_ref, g1_ref, be1_ref,
                    w2_ref, g2_ref, be2_ref,
                    w3_ref, b3_ref,
                    o_ref,
                    bn1_ref, bn2_ref,
                    *, inv_batch):
    """3-pass batch-tiled decoder. BN scratch rows: [sum, sumsq, scale, shift]."""
    p = pl.program_id(0)        # pass axis (sequential)
    bt = pl.program_id(1)       # batch-tile axis
    nb = pl.num_programs(1)

    def h1_tile():
        # No +b1: bias cancels exactly under training-mode BatchNorm.
        return jnp.dot(x_ref[...], w1_ref[...], preferred_element_type=jnp.float32)

    def bn_apply(h, bn_ref):
        return h * bn_ref[2:3, :] + bn_ref[3:4, :]

    def accumulate(h, bn_ref):
        bn_ref[0:1, :] += jnp.sum(h, axis=0, keepdims=True)
        bn_ref[1:2, :] += jnp.sum(h * h, axis=0, keepdims=True)

    def finalize(bn_ref, g_ref, be_ref):
        m = bn_ref[0:1, :] * inv_batch
        v = bn_ref[1:2, :] * inv_batch - m * m          # biased variance
        scale = g_ref[...] * jax.lax.rsqrt(v + EPS)
        bn_ref[2:3, :] = scale
        bn_ref[3:4, :] = be_ref[...] - m * scale

    @pl.when(p == 0)
    def _():
        @pl.when(bt == 0)
        def _():
            bn1_ref[...] = jnp.zeros_like(bn1_ref)
        accumulate(h1_tile(), bn1_ref)

        @pl.when(bt == nb - 1)
        def _():
            finalize(bn1_ref, g1_ref, be1_ref)

    @pl.when(p == 1)
    def _():
        @pl.when(bt == 0)
        def _():
            bn2_ref[...] = jnp.zeros_like(bn2_ref)
        h2 = jnp.dot(bn_apply(h1_tile(), bn1_ref), w2_ref[...],
                     preferred_element_type=jnp.float32)   # no +b2, cancels in BN2
        accumulate(h2, bn2_ref)

        @pl.when(bt == nb - 1)
        def _():
            finalize(bn2_ref, g2_ref, be2_ref)

    @pl.when(p == 2)
    def _():
        h2 = jnp.dot(bn_apply(h1_tile(), bn1_ref), w2_ref[...],
                     preferred_element_type=jnp.float32)
        h2 = bn_apply(h2, bn2_ref)
        out = jnp.dot(h2, w3_ref[...], preferred_element_type=jnp.float32) + b3_ref[...]
        o_ref[...] = out.astype(o_ref.dtype)               # lane-dense (128-wide) store


def _pick_batch_tile(batch):
    for tb in (512, 256, 128, 64, 32, 16, 8):
        if batch % tb == 0:
            return tb
    return batch   # odd batch: one full-batch tile (block dim == array dim is legal)


def decoder_forward(x, padded, action_length, *, tile_b=None):
    """x: [B, num_classes] f32, padded: lane-padded params -> [B, action_length]."""
    B, C = x.shape
    H1P = padded["w1"].shape[1]
    H2P = padded["w2"].shape[1]
    OP = padded["w3"].shape[1]
    tb = tile_b if tile_b is not None else _pick_batch_tile(B)
    assert B % tb == 0, (B, tb)
    nb = B // tb

    kernel = functools.partial(_decoder_kernel, inv_batch=1.0 / B)

    full = lambda p, b: (0, 0)
    batch_tile = lambda p, b: (b, 0)

    cost = pl.CostEstimate(
        flops=2 * B * (3 * C * H1P + 2 * H1P * H2P + H2P * OP),
        transcendentals=2 * (H1P + H2P),
        bytes_accessed=4 * (3 * B * C + B * OP
                            + C * H1P + H1P * H2P + H2P * OP
                            + 3 * (H1P + H2P) + OP),
    )

    out = pl.pallas_call(
        kernel,
        out_shape=jax.ShapeDtypeStruct((B, OP), jnp.float32),
        grid_spec=pltpu.PrefetchScalarGridSpec(
            num_scalar_prefetch=0,
            grid=(3, nb),
            in_specs=[
                pl.BlockSpec((tb, C), batch_tile),    # x tile
                pl.BlockSpec((C, H1P), full),         # w1 (resident)
                pl.BlockSpec((1, H1P), full),         # gamma1
                pl.BlockSpec((1, H1P), full),         # beta1
                pl.BlockSpec((H1P, H2P), full),       # w2
                pl.BlockSpec((1, H2P), full),         # gamma2
                pl.BlockSpec((1, H2P), full),         # beta2
                pl.BlockSpec((H2P, OP), full),        # w3
                pl.BlockSpec((1, OP), full),          # b3
            ],
            out_specs=pl.BlockSpec((tb, OP), batch_tile),
            scratch_shapes=[
                pltpu.VMEM((4, H1P), jnp.float32),    # BN1: sum / sumsq / scale / shift
                pltpu.VMEM((4, H2P), jnp.float32),    # BN2
            ],
        ),
        compiler_params=pltpu.CompilerParams(
            # Pass axis must be sequential (BN stats); batch axis accumulates
            # into a single VMEM scratch so it is sequential too.
            dimension_semantics=("arbitrary", "arbitrary"),
            # Generation-safe budget: working set < 2 MiB, leaves headroom on
            # v7x's 64 MiB physical VMEM while keeping double-buffering alive.
            vmem_limit_bytes=32 * 1024 * 1024,
        ),
        cost_estimate=cost,
    )(x, padded["w1"], padded["g1"], padded["be1"],
      padded["w2"], padded["g2"], padded["be2"],
      padded["w3"], padded["b3"])
    return out[:, :action_length]


def init_params(key, num_classes, action_length=3):
    """PyTorch-shaped params (unpadded). Linear weights stored [in, out]."""
    dims = [(num_classes, _H1), (_H1, _H2), (_H2, action_length)]
    keys = jax.random.split(key, 6)
    params = {}
    for i, (fin, fout) in enumerate(dims, start=1):
        bound = 1.0 / float(fin) ** 0.5
        params[f"w{i}"] = jax.random.uniform(keys[2 * i - 2], (fin, fout),
                                             jnp.float32, -bound, bound)
        params[f"b{i}"] = jax.random.uniform(keys[2 * i - 1], (1, fout),
                                             jnp.float32, -bound, bound)
    params["g1"] = jnp.ones((1, _H1), jnp.float32)
    params["be1"] = jnp.zeros((1, _H1), jnp.float32)
    params["g2"] = jnp.ones((1, _H2), jnp.float32)
    params["be2"] = jnp.zeros((1, _H2), jnp.float32)
    return params


def pad_params(params, num_classes, action_length):
    """Zero-pad feature dims to lane (128) multiples, once, outside the kernel.

    Padded gamma/beta are zero, so padded hidden lanes stay exactly zero
    through both BatchNorms and cannot leak into real outputs. b1/b2 are
    dropped entirely (cancelled by BN).
    """
    h1p = _round_up(_H1, _LANE)
    h2p = _round_up(_H2, _LANE)
    op = _round_up(action_length, _LANE)

    def pad2(a, rows, cols):
        return jnp.pad(a, ((0, rows - a.shape[0]), (0, cols - a.shape[1])))

    return {
        "w1": pad2(params["w1"], num_classes, h1p),
        "g1": pad2(params["g1"], 1, h1p),
        "be1": pad2(params["be1"], 1, h1p),
        "w2": pad2(params["w2"], h1p, h2p),
        "g2": pad2(params["g2"], 1, h2p),
        "be2": pad2(params["be2"], 1, h2p),
        "w3": pad2(params["w3"], h2p, op),
        "b3": pad2(params["b3"], 1, op),
    }


def decoder_reference(x, params):
    """Pure-JAX reference (PyTorch training-mode BatchNorm1d semantics)."""
    h = x @ params["w1"] + params["b1"]
    m = h.mean(0, keepdims=True)
    v = ((h - m) ** 2).mean(0, keepdims=True)
    h = (h - m) / jnp.sqrt(v + EPS) * params["g1"] + params["be1"]
    h = h @ params["w2"] + params["b2"]
    m = h.mean(0, keepdims=True)
    v = ((h - m) ** 2).mean(0, keepdims=True)
    h = (h - m) / jnp.sqrt(v + EPS) * params["g2"] + params["be2"]
    return h @ params["w3"] + params["b3"]


if __name__ == "__main__":
    num_classes = 32
    action_length = 3
    batch = 16   # small; tile_b=8 below exercises multi-tile BN-stat accumulation

    key = jax.random.PRNGKey(0)
    pkey, xkey = jax.random.split(key)
    params = init_params(pkey, num_classes, action_length)
    padded = pad_params(params, num_classes, action_length)
    x = jax.random.normal(xkey, (batch, num_classes), jnp.float32)

    out = decoder_forward(x, padded, action_length, tile_b=8)
    out = jax.block_until_ready(out)

    ref = decoder_reference(x, params)
    assert out.shape == (batch, action_length), out.shape
    assert jnp.allclose(out, ref, atol=1e-4, rtol=1e-4), (
        "mismatch vs reference, max abs err = %g"
        % float(jnp.max(jnp.abs(out - ref))))

    print("KERNEL_OK")
</pallas_src>

<mosaic_0001>
module attributes {stable_mosaic.version = 11 : i64} {
  func.func @_decoder_kernel(%arg0: i32, %arg1: i32, %arg2: memref<8x32xf32, #tpu.memory_space<vmem>>, %arg3: memref<32x256xf32, #tpu.memory_space<vmem>>, %arg4: memref<1x256xf32, #tpu.memory_space<vmem>>, %arg5: memref<1x256xf32, #tpu.memory_space<vmem>>, %arg6: memref<256x384xf32, #tpu.memory_space<vmem>>, %arg7: memref<1x384xf32, #tpu.memory_space<vmem>>, %arg8: memref<1x384xf32, #tpu.memory_space<vmem>>, %arg9: memref<384x128xf32, #tpu.memory_space<vmem>>, %arg10: memref<1x128xf32, #tpu.memory_space<vmem>>, %arg11: memref<8x128xf32, #tpu.memory_space<vmem>>, %arg12: memref<4x256xf32, #tpu.memory_space<vmem>>, %arg13: memref<4x384xf32, #tpu.memory_space<vmem>>) attributes {dimension_semantics = [#tpu.dimension_semantics<arbitrary>, #tpu.dimension_semantics<arbitrary>], iteration_bounds = array<i64: 3, 2>, scalar_prefetch = 0 : i64, scratch_operands = 2 : i64, tpu.core_type = #tpu.core_type<tc>, window_params = [{transform_indices = @transform_0, window_bounds = array<i64: 8, 32>}, {pipeline_mode = #tpu.pipeline_mode<synchronous>, transform_indices = @transform_1, window_bounds = array<i64: 32, 256>}, {pipeline_mode = #tpu.pipeline_mode<synchronous>, transform_indices = @transform_2, window_bounds = array<i64: 1, 256>}, {pipeline_mode = #tpu.pipeline_mode<synchronous>, transform_indices = @transform_3, window_bounds = array<i64: 1, 256>}, {pipeline_mode = #tpu.pipeline_mode<synchronous>, transform_indices = @transform_4, window_bounds = array<i64: 256, 384>}, {pipeline_mode = #tpu.pipeline_mode<synchronous>, transform_indices = @transform_5, window_bounds = array<i64: 1, 384>}, {pipeline_mode = #tpu.pipeline_mode<synchronous>, transform_indices = @transform_6, window_bounds = array<i64: 1, 384>}, {pipeline_mode = #tpu.pipeline_mode<synchronous>, transform_indices = @transform_7, window_bounds = array<i64: 384, 128>}, {pipeline_mode = #tpu.pipeline_mode<synchronous>, transform_indices = @transform_8, window_bounds = array<i64: 1, 128>}, {transform_indices = @transform_9, window_bounds = array<i64: 8, 128>}]} {
    %c0_i32 = arith.constant 0 : i32
    %0 = arith.cmpi eq, %arg0, %c0_i32 : i32
    %1 = arith.extui %0 : i1 to i32
    %c0_i32_0 = arith.constant 0 : i32
    %2 = arith.cmpi ne, %1, %c0_i32_0 : i32
    scf.if %2 {
      %c0_i32_3 = arith.constant 0 : i32
      %9 = arith.cmpi eq, %arg1, %c0_i32_3 : i32
      %10 = arith.extui %9 : i1 to i32
      %c0_i32_4 = arith.constant 0 : i32
      %11 = arith.cmpi ne, %10, %c0_i32_4 : i32
      scf.if %11 {
        %cst_19 = arith.constant 0.000000e+00 : f32
        %29 = vector.broadcast %cst_19 : f32 to vector<4x256xf32>
        %c0_20 = arith.constant 0 : index
        %c0_21 = arith.constant 0 : index
        %30 = vector.load %arg12[%c0_20, %c0_21] : memref<4x256xf32, #tpu.memory_space<vmem>>, vector<4x256xf32>
        tpu.vector_store %arg12[%c0_20, %c0_21], %29 {strides = array<i32>} : memref<4x256xf32, #tpu.memory_space<vmem>>, vector<4x256xf32>,
      } else {
      }
      %c0 = arith.constant 0 : index
      %c0_5 = arith.constant 0 : index
      %12 = vector.load %arg2[%c0, %c0_5] : memref<8x32xf32, #tpu.memory_space<vmem>>, vector<8x32xf32>
      %c0_6 = arith.constant 0 : index
      %c0_7 = arith.constant 0 : index
      %13 = vector.load %arg3[%c0_6, %c0_7] : memref<32x256xf32, #tpu.memory_space<vmem>>, vector<32x256xf32>
      %cst = arith.constant dense<0.000000e+00> : vector<8x256xf32>
      %14 = tpu.matmul %12, %13, %cst {dimension_numbers = #tpu.dot_dimension_numbers<[1], [0], [0], [1], [0, 0, 1, 1], [], []>} : vector<8x32xf32>, vector<32x256xf32>, vector<8x256xf32> -> vector<8x256xf32>
      %c0_8 = arith.constant 0 : index
      %c0_9 = arith.constant 0 : index
      %15 = vector.load %arg12[%c0_8, %c0_9] : memref<4x256xf32, #tpu.memory_space<vmem>>, vector<1x256xf32>
      %cst_10 = arith.constant dense<0.000000e+00> : vector<256xf32>
      %16 = vector.multi_reduction <add>, %14, %cst_10 [0] : vector<8x256xf32> to vector<256xf32>
      %17 = vector.shape_cast %16 : vector<256xf32> to vector<1x256xf32>
      %18 = arith.addf %15, %17 : vector<1x256xf32>
      %c0_11 = arith.constant 0 : index
      %c0_12 = arith.constant 0 : index
      %19 = vector.load %arg12[%c0_11, %c0_12] : memref<4x256xf32, #tpu.memory_space<vmem>>, vector<1x256xf32>
      tpu.vector_store %arg12[%c0_11, %c0_12], %18 {strides = array<i32>} : memref<4x256xf32, #tpu.memory_space<vmem>>, vector<1x256xf32>,
      %c1 = arith.constant 1 : index
      %c0_13 = arith.constant 0 : index
      %20 = vector.load %arg12[%c1, %c0_13] : memref<4x256xf32, #tpu.memory_space<vmem>>, vector<1x256xf32>
      %21 = arith.mulf %14, %14 : vector<8x256xf32>
      %cst_14 = arith.constant dense<0.000000e+00> : vector<256xf32>
      %22 = vector.multi_reduction <add>, %21, %cst_14 [0] : vector<8x256xf32> to vector<256xf32>
      %23 = vector.shape_cast %22 : vector<256xf32> to vector<1x256xf32>
      %24 = arith.addf %20, %23 : vector<1x256xf32>
      %c1_15 = arith.constant 1 : index
      %c0_16 = arith.constant 0 : index
      %25 = vector.load %arg12[%c1_15, %c0_16] : memref<4x256xf32, #tpu.memory_space<vmem>>, vector<1x256xf32>
      tpu.vector_store %arg12[%c1_15, %c0_16], %24 {strides = array<i32>} : memref<4x256xf32, #tpu.memory_space<vmem>>, vector<1x256xf32>,
      %c1_i32_17 = arith.constant 1 : i32
      %26 = arith.cmpi eq, %arg1, %c1_i32_17 : i32
      %27 = arith.extui %26 : i1 to i32
      %c0_i32_18 = arith.constant 0 : i32
      %28 = arith.cmpi ne, %27, %c0_i32_18 : i32
      scf.if %28 {
        %c0_19 = arith.constant 0 : index
        %c0_20 = arith.constant 0 : index
        %29 = vector.load %arg12[%c0_19, %c0_20] : memref<4x256xf32, #tpu.memory_space<vmem>>, vector<1x256xf32>
        %cst_21 = arith.constant 6.250000e-02 : f32
        %30 = vector.broadcast %cst_21 : f32 to vector<1x256xf32>
        %31 = arith.mulf %29, %30 : vector<1x256xf32>
        %c1_22 = arith.constant 1 : index
        %c0_23 = arith.constant 0 : index
        %32 = vector.load %arg12[%c1_22, %c0_23] : memref<4x256xf32, #tpu.memory_space<vmem>>, vector<1x256xf32>
        %cst_24 = arith.constant 6.250000e-02 : f32
        %33 = vector.broadcast %cst_24 : f32 to vector<1x256xf32>
        %34 = arith.mulf %32, %33 : vector<1x256xf32>
        %35 = arith.mulf %31, %31 : vector<1x256xf32>
        %36 = arith.subf %34, %35 : vector<1x256xf32>
        %c0_25 = arith.constant 0 : index
        %c0_26 = arith.constant 0 : index
        %37 = vector.load %arg4[%c0_25, %c0_26] : memref<1x256xf32, #tpu.memory_space<vmem>>, vector<1x256xf32>
        %cst_27 = arith.constant 9.99999974E-6 : f32
        %38 = vector.broadcast %cst_27 : f32 to vector<1x256xf32>
        %39 = arith.addf %36, %38 : vector<1x256xf32>
        %40 = math.rsqrt %39 : vector<1x256xf32>
        %41 = arith.mulf %37, %40 : vector<1x256xf32>
        %c2 = arith.constant 2 : index
        %c0_28 = arith.constant 0 : index
        %42 = vector.load %arg12[%c2, %c0_28] : memref<4x256xf32, #tpu.memory_space<vmem>>, vector<1x256xf32>
        tpu.vector_store %arg12[%c2, %c0_28], %41 {strides = array<i32>} : memref<4x256xf32, #tpu.memory_space<vmem>>, vector<1x256xf32>,
        %c0_29 = arith.constant 0 : index
        %c0_30 = arith.constant 0 : index
        %43 = vector.load %arg5[%c0_29, %c0_30] : memref<1x256xf32, #tpu.memory_space<vmem>>, vector<1x256xf32>
        %44 = arith.mulf %31, %41 : vector<1x256xf32>
        %45 = arith.subf %43, %44 : vector<1x256xf32>
        %c3 = arith.constant 3 : index
        %c0_31 = arith.constant 0 : index
        %46 = vector.load %arg12[%c3, %c0_31] : memref<4x256xf32, #tpu.memory_space<vmem>>, vector<1x256xf32>
        tpu.vector_store %arg12[%c3, %c0_31], %45 {strides = array<i32>} : memref<4x256xf32, #tpu.memory_space<vmem>>, vector<1x256xf32>,
      } else {
      }
    } else {
    }
    %c1_i32 = arith.constant 1 : i32
    %3 = arith.cmpi eq, %arg0, %c1_i32 : i32
    %4 = arith.extui %3 : i1 to i32
    %c0_i32_1 = arith.constant 0 : i32
    %5 = arith.cmpi ne, %4, %c0_i32_1 : i32
    scf.if %5 {
      %c0_i32_3 = arith.constant 0 : i32
      %9 = arith.cmpi eq, %arg1, %c0_i32_3 : i32
      %10 = arith.extui %9 : i1 to i32
      %c0_i32_4 = arith.constant 0 : i32
      %11 = arith.cmpi ne, %10, %c0_i32_4 : i32
      scf.if %11 {
        %cst_24 = arith.constant 0.000000e+00 : f32
        %37 = vector.broadcast %cst_24 : f32 to vector<4x384xf32>
        %c0_25 = arith.constant 0 : index
        %c0_26 = arith.constant 0 : index
        %38 = vector.load %arg13[%c0_25, %c0_26] : memref<4x384xf32, #tpu.memory_space<vmem>>, vector<4x384xf32>
        tpu.vector_store %arg13[%c0_25, %c0_26], %37 {strides = array<i32>} : memref<4x384xf32, #tpu.memory_space<vmem>>, vector<4x384xf32>,
      } else {
      }
      %c0 = arith.constant 0 : index
      %c0_5 = arith.constant 0 : index
      %12 = vector.load %arg2[%c0, %c0_5] : memref<8x32xf32, #tpu.memory_space<vmem>>, vector<8x32xf32>
      %c0_6 = arith.constant 0 : index
      %c0_7 = arith.constant 0 : index
      %13 = vector.load %arg3[%c0_6, %c0_7] : memref<32x256xf32, #tpu.memory_space<vmem>>, vector<32x256xf32>
      %cst = arith.constant dense<0.000000e+00> : vector<8x256xf32>
      %14 = tpu.matmul %12, %13, %cst {dimension_numbers = #tpu.dot_dimension_numbers<[1], [0], [0], [1], [0, 0, 1, 1], [], []>} : vector<8x32xf32>, vector<32x256xf32>, vector<8x256xf32> -> vector<8x256xf32>
      %c2 = arith.constant 2 : index
      %c0_8 = arith.constant 0 : index
      %15 = vector.load %arg12[%c2, %c0_8] : memref<4x256xf32, #tpu.memory_space<vmem>>, vector<1x256xf32>
      %16 = vector.broadcast %15 : vector<1x256xf32> to vector<8x256xf32>
      %17 = arith.mulf %14, %16 : vector<8x256xf32>
      %c3 = arith.constant 3 : index
      %c0_9 = arith.constant 0 : index
      %18 = vector.load %arg12[%c3, %c0_9] : memref<4x256xf32, #tpu.memory_space<vmem>>, vector<1x256xf32>
      %19 = vector.broadcast %18 : vector<1x256xf32> to vector<8x256xf32>
      %20 = arith.addf %17, %19 : vector<8x256xf32>
      %c0_10 = arith.constant 0 : index
      %c0_11 = arith.constant 0 : index
      %21 = vector.load %arg6[%c0_10, %c0_11] : memref<256x384xf32, #tpu.memory_space<vmem>>, vector<256x384xf32>
      %cst_12 = arith.constant dense<0.000000e+00> : vector<8x384xf32>
      %22 = tpu.matmul %20, %21, %cst_12 {dimension_numbers = #tpu.dot_dimension_numbers<[1], [0], [0], [1], [0, 0, 1, 1], [], []>} : vector<8x256xf32>, vector<256x384xf32>, vector<8x384xf32> -> vector<8x384xf32>
      %c0_13 = arith.constant 0 : index
      %c0_14 = arith.constant 0 : index
      %23 = vector.load %arg13[%c0_13, %c0_14] : memref<4x384xf32, #tpu.memory_space<vmem>>, vector<1x384xf32>
      %cst_15 = arith.constant dense<0.000000e+00> : vector<384xf32>
      %24 = vector.multi_reduction <add>, %22, %cst_15 [0] : vector<8x384xf32> to vector<384xf32>
      %25 = vector.shape_cast %24 : vector<384xf32> to vector<1x384xf32>
      %26 = arith.addf %23, %25 : vector<1x384xf32>
      %c0_16 = arith.constant 0 : index
      %c0_17 = arith.constant 0 : index
      %27 = vector.load %arg13[%c0_16, %c0_17] : memref<4x384xf32, #tpu.memory_space<vmem>>, vector<1x384xf32>
      tpu.vector_store %arg13[%c0_16, %c0_17], %26 {strides = array<i32>} : memref<4x384xf32, #tpu.memory_space<vmem>>, vector<1x384xf32>,
      %c1 = arith.constant 1 : index
      %c0_18 = arith.constant 0 : index
      %28 = vector.load %arg13[%c1, %c0_18] : memref<4x384xf32, #tpu.memory_space<vmem>>, vector<1x384xf32>
      %29 = arith.mulf %22, %22 : vector<8x384xf32>
      %cst_19 = arith.constant dense<0.000000e+00> : vector<384xf32>
      %30 = vector.multi_reduction <add>, %29, %cst_19 [0] : vector<8x384xf32> to vector<384xf32>
      %31 = vector.shape_cast %30 : vector<384xf32> to vector<1x384xf32>
      %32 = arith.addf %28, %31 : vector<1x384xf32>
      %c1_20 = arith.constant 1 : index
      %c0_21 = arith.constant 0 : index
      %33 = vector.load %arg13[%c1_20, %c0_21] : memref<4x384xf32, #tpu.memory_space<vmem>>, vector<1x384xf32>
      tpu.vector_store %arg13[%c1_20, %c0_21], %32 {strides = array<i32>} : memref<4x384xf32, #tpu.memory_space<vmem>>, vector<1x384xf32>,
      %c1_i32_22 = arith.constant 1 : i32
      %34 = arith.cmpi eq, %arg1, %c1_i32_22 : i32
      %35 = arith.extui %34 : i1 to i32
      %c0_i32_23 = arith.constant 0 : i32
      %36 = arith.cmpi ne, %35, %c0_i32_23 : i32
      scf.if %36 {
        %c0_24 = arith.constant 0 : index
        %c0_25 = arith.constant 0 : index
        %37 = vector.load %arg13[%c0_24, %c0_25] : memref<4x384xf32, #tpu.memory_space<vmem>>, vector<1x384xf32>
        %cst_26 = arith.constant 6.250000e-02 : f32
        %38 = vector.broadcast %cst_26 : f32 to vector<1x384xf32>
        %39 = arith.mulf %37, %38 : vector<1x384xf32>
        %c1_27 = arith.constant 1 : index
        %c0_28 = arith.constant 0 : index
        %40 = vector.load %arg13[%c1_27, %c0_28] : memref<4x384xf32, #tpu.memory_space<vmem>>, vector<1x384xf32>
        %cst_29 = arith.constant 6.250000e-02 : f32
        %41 = vector.broadcast %cst_29 : f32 to vector<1x384xf32>
        %42 = arith.mulf %40, %41 : vector<1x384xf32>
        %43 = arith.mulf %39, %39 : vector<1x384xf32>
        %44 = arith.subf %42, %43 : vector<1x384xf32>
        %c0_30 = arith.constant 0 : index
        %c0_31 = arith.constant 0 : index
        %45 = vector.load %arg7[%c0_30, %c0_31] : memref<1x384xf32, #tpu.memory_space<vmem>>, vector<1x384xf32>
        %cst_32 = arith.constant 9.99999974E-6 : f32
        %46 = vector.broadcast %cst_32 : f32 to vector<1x384xf32>
        %47 = arith.addf %44, %46 : vector<1x384xf32>
        %48 = math.rsqrt %47 : vector<1x384xf32>
        %49 = arith.mulf %45, %48 : vector<1x384xf32>
        %c2_33 = arith.constant 2 : index
        %c0_34 = arith.constant 0 : index
        %50 = vector.load %arg13[%c2_33, %c0_34] : memref<4x384xf32, #tpu.memory_space<vmem>>, vector<1x384xf32>
        tpu.vector_store %arg13[%c2_33, %c0_34], %49 {strides = array<i32>} : memref<4x384xf32, #tpu.memory_space<vmem>>, vector<1x384xf32>,
        %c0_35 = arith.constant 0 : index
        %c0_36 = arith.constant 0 : index
        %51 = vector.load %arg8[%c0_35, %c0_36] : memref<1x384xf32, #tpu.memory_space<vmem>>, vector<1x384xf32>
        %52 = arith.mulf %39, %49 : vector<1x384xf32>
        %53 = arith.subf %51, %52 : vector<1x384xf32>
        %c3_37 = arith.constant 3 : index
        %c0_38 = arith.constant 0 : index
        %54 = vector.load %arg13[%c3_37, %c0_38] : memref<4x384xf32, #tpu.memory_space<vmem>>, vector<1x384xf32>
        tpu.vector_store %arg13[%c3_37, %c0_38], %53 {strides = array<i32>} : memref<4x384xf32, #tpu.memory_space<vmem>>, vector<1x384xf32>,
      } else {
      }
    } else {
    }
    %c2_i32 = arith.constant 2 : i32
    %6 = arith.cmpi eq, %arg0, %c2_i32 : i32
    %7 = arith.extui %6 : i1 to i32
    %c0_i32_2 = arith.constant 0 : i32
    %8 = arith.cmpi ne, %7, %c0_i32_2 : i32
    scf.if %8 {
      %c0 = arith.constant 0 : index
      %c0_3 = arith.constant 0 : index
      %9 = vector.load %arg2[%c0, %c0_3] : memref<8x32xf32, #tpu.memory_space<vmem>>, vector<8x32xf32>
      %c0_4 = arith.constant 0 : index
      %c0_5 = arith.constant 0 : index
      %10 = vector.load %arg3[%c0_4, %c0_5] : memref<32x256xf32, #tpu.memory_space<vmem>>, vector<32x256xf32>
      %cst = arith.constant dense<0.000000e+00> : vector<8x256xf32>
      %11 = tpu.matmul %9, %10, %cst {dimension_numbers = #tpu.dot_dimension_numbers<[1], [0], [0], [1], [0, 0, 1, 1], [], []>} : vector<8x32xf32>, vector<32x256xf32>, vector<8x256xf32> -> vector<8x256xf32>
      %c2 = arith.constant 2 : index
      %c0_6 = arith.constant 0 : index
      %12 = vector.load %arg12[%c2, %c0_6] : memref<4x256xf32, #tpu.memory_space<vmem>>, vector<1x256xf32>
      %13 = vector.broadcast %12 : vector<1x256xf32> to vector<8x256xf32>
      %14 = arith.mulf %11, %13 : vector<8x256xf32>
      %c3 = arith.constant 3 : index
      %c0_7 = arith.constant 0 : index
      %15 = vector.load %arg12[%c3, %c0_7] : memref<4x256xf32, #tpu.memory_space<vmem>>, vector<1x256xf32>
      %16 = vector.broadcast %15 : vector<1x256xf32> to vector<8x256xf32>
      %17 = arith.addf %14, %16 : vector<8x256xf32>
      %c0_8 = arith.constant 0 : index
      %c0_9 = arith.constant 0 : index
      %18 = vector.load %arg6[%c0_8, %c0_9] : memref<256x384xf32, #tpu.memory_space<vmem>>, vector<256x384xf32>
      %cst_10 = arith.constant dense<0.000000e+00> : vector<8x384xf32>
      %19 = tpu.matmul %17, %18, %cst_10 {dimension_numbers = #tpu.dot_dimension_numbers<[1], [0], [0], [1], [0, 0, 1, 1], [], []>} : vector<8x256xf32>, vector<256x384xf32>, vector<8x384xf32> -> vector<8x384xf32>
      %c2_11 = arith.constant 2 : index
      %c0_12 = arith.constant 0 : index
      %20 = vector.load %arg13[%c2_11, %c0_12] : memref<4x384xf32, #tpu.memory_space<vmem>>, vector<1x384xf32>
      %21 = vector.broadcast %20 : vector<1x384xf32> to vector<8x384xf32>
      %22 = arith.mulf %19, %21 : vector<8x384xf32>
      %c3_13 = arith.constant 3 : index
      %c0_14 = arith.constant 0 : index
      %23 = vector.load %arg13[%c3_13, %c0_14] : memref<4x384xf32, #tpu.memory_space<vmem>>, vector<1x384xf32>
      %24 = vector.broadcast %23 : vector<1x384xf32> to vector<8x384xf32>
      %25 = arith.addf %22, %24 : vector<8x384xf32>
      %c0_15 = arith.constant 0 : index
      %c0_16 = arith.constant 0 : index
      %26 = vector.load %arg9[%c0_15, %c0_16] : memref<384x128xf32, #tpu.memory_space<vmem>>, vector<384x128xf32>
      %cst_17 = arith.constant dense<0.000000e+00> : vector<8x128xf32>
      %27 = tpu.matmul %25, %26, %cst_17 {dimension_numbers = #tpu.dot_dimension_numbers<[1], [0], [0], [1], [0, 0, 1, 1], [], []>} : vector<8x384xf32>, vector<384x128xf32>, vector<8x128xf32> -> vector<8x128xf32>
      %c0_18 = arith.constant 0 : index
      %c0_19 = arith.constant 0 : index
      %28 = vector.load %arg10[%c0_18, %c0_19] : memref<1x128xf32, #tpu.memory_space<vmem>>, vector<1x128xf32>
      %29 = vector.broadcast %28 : vector<1x128xf32> to vector<8x128xf32>
      %30 = arith.addf %27, %29 : vector<8x128xf32>
      %c0_20 = arith.constant 0 : index
      %c0_21 = arith.constant 0 : index
      %31 = vector.load %arg11[%c0_20, %c0_21] : memref<8x128xf32, #tpu.memory_space<vmem>>, vector<8x128xf32>
      tpu.vector_store %arg11[%c0_20, %c0_21], %30 {strides = array<i32>} : memref<8x128xf32, #tpu.memory_space<vmem>>, vector<8x128xf32>,
    } else {
    }
    return
  }
  func.func @transform_0(%arg0: i32, %arg1: i32) -> (i32, i32) {
    %c0_i32 = arith.constant 0 : i32
    %c0_i32_0 = arith.constant 0 : i32
    return %arg1, %c0_i32 : i32, i32
  }
  func.func @transform_1(%arg0: i32, %arg1: i32) -> (i32, i32) {
    %c0_i32 = arith.constant 0 : i32
    %c0_i32_0 = arith.constant 0 : i32
    %c0_i32_1 = arith.constant 0 : i32
    return %c0_i32, %c0_i32_0 : i32, i32
  }
  func.func @transform_2(%arg0: i32, %arg1: i32) -> (i32, i32) {
    %c0_i32 = arith.constant 0 : i32
    %c0_i32_0 = arith.constant 0 : i32
    %c0_i32_1 = arith.constant 0 : i32
    return %c0_i32, %c0_i32_0 : i32, i32
  }
  func.func @transform_3(%arg0: i32, %arg1: i32) -> (i32, i32) {
    %c0_i32 = arith.constant 0 : i32
    %c0_i32_0 = arith.constant 0 : i32
    %c0_i32_1 = arith.constant 0 : i32
    return %c0_i32, %c0_i32_0 : i32, i32
  }
  func.func @transform_4(%arg0: i32, %arg1: i32) -> (i32, i32) {
    %c0_i32 = arith.constant 0 : i32
    %c0_i32_0 = arith.constant 0 : i32
    %c0_i32_1 = arith.constant 0 : i32
    return %c0_i32, %c0_i32_0 : i32, i32
  }
  func.func @transform_5(%arg0: i32, %arg1: i32) -> (i32, i32) {
    %c0_i32 = arith.constant 0 : i32
    %c0_i32_0 = arith.constant 0 : i32
    %c0_i32_1 = arith.constant 0 : i32
    return %c0_i32, %c0_i32_0 : i32, i32
  }
  func.func @transform_6(%arg0: i32, %arg1: i32) -> (i32, i32) {
    %c0_i32 = arith.constant 0 : i32
    %c0_i32_0 = arith.constant 0 : i32
    %c0_i32_1 = arith.constant 0 : i32
    return %c0_i32, %c0_i32_0 : i32, i32
  }
  func.func @transform_7(%arg0: i32, %arg1: i32) -> (i32, i32) {
    %c0_i32 = arith.constant 0 : i32
    %c0_i32_0 = arith.constant 0 : i32
    %c0_i32_1 = arith.constant 0 : i32
    return %c0_i32, %c0_i32_0 : i32, i32
  }
  func.func @transform_8(%arg0: i32, %arg1: i32) -> (i32, i32) {
    %c0_i32 = arith.constant 0 : i32
    %c0_i32_0 = arith.constant 0 : i32
    %c0_i32_1 = arith.constant 0 : i32
    return %c0_i32, %c0_i32_0 : i32, i32
  }
  func.func @transform_9(%arg0: i32, %arg1: i32) -> (i32, i32) {
    %c0_i32 = arith.constant 0 : i32
    %c0_i32_0 = arith.constant 0 : i32
    return %arg1, %c0_i32 : i32, i32
  }
}

</mosaic_0001>

<bundles_post_ra>
// kernel: tpu_custom_call.1
= control target key start
LH: loop header
LB: loop body
LE: loop exit
PB: predicated region body
PF: predicated region fallthrough
CT: control target
= control target key end

     0   :  { %s2832_s0 = inlined_call_operand.hbm [shape: f32[16,32], index: 0, kind: input, shape index: {}]   ;;  %s2833_s1 = inlined_call_operand.hbm [shape: f32[32,256], index: 1, kind: input, shape index: {}]   ;;  %s2834_s2 = inlined_call_operand.hbm [shape: f32[1,256], index: 2, kind: input, shape index: {}]   ;;  %s2835_s3 = inlined_call_operand.hbm [shape: f32[1,256], index: 3, kind: input, shape index: {}]   ;;  %s2836_s4 = inlined_call_operand.hbm [shape: f32[256,384], index: 4, kind: input, shape index: {}]   ;;  %s2837_s5 = inlined_call_operand.vmem [shape: f32[1,384], index: 5, kind: input, shape index: {}]   ;;  %s2838_s6 = inlined_call_operand.vmem [shape: f32[1,384], index: 6, kind: input, shape index: {}]   ;;  %s2839_s7 = inlined_call_operand.hbm [shape: f32[384,128], index: 7, kind: input, shape index: {}]   ;;  %s2840_s8 = inlined_call_operand.vmem [shape: f32[1,128], index: 8, kind: input, shape index: {}]   ;;  %s2841_s9 = inlined_call_operand.hbm [shape: f32[16,128], index: 9, kind: output, shape index: {}]  }
   0x1   :  { %2849 = sst [smem:[#allocation24_spill]] %s2833_s1 }
   0x2   :  { %2850 = sst [smem:[#allocation25_spill]] %s2834_s2 }
   0x3   :  { %2851 = sst [smem:[#allocation26_spill]] %s2835_s3 }
   0x4   :  { %2852 = sst [smem:[#allocation27_spill]] %s2836_s4 }
   0x5   :  { %2853 = sst [smem:[#allocation28_spill]] %s2839_s7 }
   0x6   :  { %2854 = sst [smem:[#allocation29_spill]] %s2841_s9 }
   0x7   :  { %14 = vsyncpa [#allocation5], 0 }
   0x8   :  { %16 = vsyncpa [#allocation5 + $0x1], 0 }
   0x9   :  { %17 = vsyncpa [#allocation8], 0 }
   0xa   :  { %18 = vsyncpa [#allocation11], 0 }
   0xb   :  { %19 = vsyncpa [#allocation14], 0 }
   0xc   :  { %20 = vsyncpa [#allocation6], 0 }
   0xd   :  { %22 = vsyncpa [#allocation6 + $0x1], 0  ;;  %s2515_s30 = smov 0   ;;  %s2517_s10 = smov 0  }
   0xe   :  { %s2519_s11 = smov 0   ;;  %s2521_s12 = smov 0  }
   0xf   :  { %s2523_s13 = smov 0   ;;  %s2525_s14 = smov 0  }
  0x10   :  { %s2527_s15 = smov 0   ;;  %s2529_s16 = smov 0  }
  0x11 LB: > { %2855 = sst [smem:[#allocation21_spill]] %s2438_s15  ;;  %s2842_s17 = sadd.s32 4294967295, %s2442_s16   ;;  %s2442_s16 = sphi %s2529_s16, %s28_s16   ;;  %s2438_s15 = sphi %s2527_s15, %s2883_s15   ;;  %s2434_s14 = sphi %s2525_s14, %s2888_s14   ;;  %s2430_s13 = sphi %s2523_s13, %s2881_s13   ;;  %s2426_s12 = sphi %s2521_s12, %s2887_s12   ;;  %s2422_s11 = sphi %s2519_s11, %s2886_s11   ;;  %s2418_s10 = sphi %s2517_s10, %s2885_s10   ;;  %s2414_s30 = sphi %s2515_s30, %s2884_s30  }
  0x12   : > { %p1840_p0 = scmp.ge.s32.totalorder %s2442_s16, 1  ;;  %p2559_p1 = scmp.eq.s32.totalorder %s2842_s17, 0 }
  0x13   : > { %p265_p2 = scmp.lt.s32.totalorder %s2442_s16, 7  ;;  %s2444_s20 = smov [#allocation7]  }
  0x14   : > { %s2856_s18 = scalar_select %p2559_p1, 1, 0 }
  0x15   : > { %p2564_p3 = pnand %p1840_p0, %p265_p2  ;;  %s277_s21 = sshll.u32 %s2444_s20, 4  ;;  %s278_s21 = int_to_ptr.vmem [resolvable:$true] %s277_s21 }
  0x16   : > { %s2445_s23 = smov [#allocation10]   ;;  %s2446_s25 = smov [#allocation9]  }
  0x17   : > { %s2857_s19 = scalar_select %p2564_p3, 1, 0 }
  0x18   : > { %p2053_p4 = pneg %p2564_p3  ;;  %s302_s24 = sshll.u32 %s2445_s23, 4  ;;  %s303_s24 = int_to_ptr.vmem [resolvable:$true] %s302_s24 }
  0x19   : > { %s291_s26 = sshll.u32 %s2446_s25, 4  ;;  %s2187_s28 = scalar_lea.vmem %s278_s21, 1024  ;;  %s292_s26 = int_to_ptr.vmem [resolvable:$true] %s291_s26 }
  0x1a   : > { %p2572_p5 = pnand %p2053_p4, %p2559_p1  ;;  %p2188_p7 = scmp.ne.s32.totalorder %s278_s21, %s2187_s28 }
  0x1b   : > { %p2195_p10 = scmp.lt.s32.totalorder %s278_s21, %s278_s21  ;;  %p2196_p11 = scmp.lt.s32.totalorder %s2187_s28, %s2187_s28 }
  0x1c   : > { %p2578_p6 = pneg %p2572_p5 }
  0x1d   : > { %p2197_p12 = por %p2196_p11, %p2195_p10 }
  0x1e   : > { %p2190_p8 = pnand %p2188_p7, %p2578_p6 }
  0x20   : > { %p2191_p9 = pneg %p2190_p8 }
  0x22   : > { %p2198_p13 = pnand %p2197_p12, %p2191_p9 }
  0x24   : > { %2201 = shalt.err (!%p2198_p13)
}
  0x25   : > { %s2447_s29 = smov 256   ;;  %s2448_s20 = smov 16  }
  0x26   : > { %s2860_s1 = sld [smem:[#allocation24_spill]]  ;;  %s2213_s17 = scalar_lea.vmem %s303_s24, 32 }
  0x27   : > { %p2214_p0 = scmp.ne.s32.totalorder %s303_s24, %s2213_s17  ;;  %p2221_p7 = scmp.lt.s32.totalorder %s303_s24, %s303_s24 }
  0x28   : > { %p2222_p8 = scmp.lt.s32.totalorder %s2213_s17, %s2213_s17 }
  0x29   : > { %p2216_p2 = pnand %p2214_p0, %p2578_p6 }
  0x2a   : > { %p2223_p3 = por %p2222_p8, %p2221_p7 }
  0x2b   : > { %p2217_p4 = pneg %p2216_p2 }
  0x2c   : > { %2056 = dma.hbm_to_vmem [thread:$0]  (!%p2572_p5), %s2860_s1, 1024, %s278_s21, [#allocation8], %s2447_s29, %s2447_s29, %s2448_s20  }
  0x2d   : > { %p2224_p10 = pnand %p2223_p3, %p2217_p4 }
  0x2f   : > { %2227 = shalt.err (!%p2224_p10)
}
  0x30   : > { %s2861_s3 = sld [smem:[#allocation26_spill]]  ;;  %s2239_s23 = scalar_lea.vmem %s292_s26, 32 }
  0x31   : > { %p2240_p9 = scmp.ne.s32.totalorder %s292_s26, %s2239_s23  ;;  %p2247_p13 = scmp.lt.s32.totalorder %s292_s26, %s292_s26 }
  0x32   : > { %p2248_p0 = scmp.lt.s32.totalorder %s2239_s23, %s2239_s23 }
  0x33   : > { %p2242_p11 = pnand %p2240_p9, %p2578_p6 }
  0x34   : > { %p2249_p2 = por %p2248_p0, %p2247_p13 }
  0x35   : > { %p2243_p12 = pneg %p2242_p11 }
  0x36   : > { %2062 = dma.hbm_to_vmem [thread:$0]  (!%p2572_p5), %s2861_s3, 32, %s303_s24, [#allocation11]  }
  0x37   : > { %p2250_p1 = pnand %p2249_p2, %p2243_p12 }
  0x39   : > { %2253 = shalt.err (!%p2250_p1)
}
  0x3a   : > { %s2862_s2 = sld [smem:[#allocation25_spill]]  ;;  %s2449_s9 = smov [#allocation12]  }
  0x3b   : > { %s312_s24 = sshll.u32 %s2449_s9, 4  ;;  %s313_s24 = int_to_ptr.vmem [resolvable:$true] %s312_s24 }
  0x3c   : > { %s2265_s29 = scalar_lea.vmem %s313_s24, 12288  ;;  %p2273_p8 = scmp.lt.s32.totalorder %s313_s24, %s313_s24 }
  0x3d   : > { %p2266_p3 = scmp.ne.s32.totalorder %s313_s24, %s2265_s29  ;;  %p2274_p10 = scmp.lt.s32.totalorder %s2265_s29, %s2265_s29 }
  0x3f   : > { %p2268_p4 = pnand %p2266_p3, %p2578_p6  ;;  %p2275_p9 = por %p2274_p10, %p2273_p8 }
  0x40   : > { %2059 = dma.hbm_to_vmem [thread:$0]  (!%p2572_p5), %s2862_s2, 32, %s292_s26, [#allocation8]  }
  0x41   : > { %p2269_p7 = pneg %p2268_p4 }
  0x43   : > { %p2276_p11 = pnand %p2275_p9, %p2269_p7 }
  0x45   : > { %2279 = shalt.err (!%p2276_p11)
}
  0x46   : > { %s2450_s20 = smov 384   ;;  %s2451_s25 = smov 24  }
  0x47   : > { %s2863_s4 = sld [smem:[#allocation27_spill]]  ;;  %s2452_s23 = smov [#allocation13]  }
  0x48   : > { %s331_s17 = sshll.u32 %s2452_s23, 4  ;;  %s332_s17 = int_to_ptr.vmem [resolvable:$true] %s331_s17 }
  0x49   : > { %s2291_s21 = scalar_lea.vmem %s332_s17, 6144  ;;  %p2299_p0 = scmp.lt.s32.totalorder %s332_s17, %s332_s17 }
  0x4a   : > { %p2292_p1 = scmp.ne.s32.totalorder %s332_s17, %s2291_s21  ;;  %p2300_p2 = scmp.lt.s32.totalorder %s2291_s21, %s2291_s21 }
  0x4c   : > { %p2294_p12 = pnand %p2292_p1, %p2578_p6  ;;  %p2301_p3 = por %p2300_p2, %p2299_p0 }
  0x4d   : > { %2065 = dma.hbm_to_vmem [thread:$0]  (!%p2572_p5), %s2863_s4, 12288, %s313_s24, [#allocation11], %s2450_s20, %s2450_s20, %s2451_s25  }
  0x4e   : > { %p2295_p13 = pneg %p2294_p12 }
  0x50   : > { %p2302_p4 = pnand %p2301_p3, %p2295_p13 }
  0x52   : > { %2305 = shalt.err (!%p2302_p4)
}
  0x53   : > { %s2453_s9 = smov 128   ;;  %s2454_s27 = smov 8  }
  0x54   : > { %s2864_s7 = sld [smem:[#allocation28_spill]]  ;;  %s1839_s20 = sadd.s32 4294967294, %s2442_s16  }
  0x55   : > { %s37_s25 = sadd.s32 1, %s2434_s14  ;;  %s40_s28 = sadd.s32 1, %s2438_s15 }
  0x56   : > { %p38_p6 = scmp.ge.s32.totalorder %s37_s25, 2  ;;  %s47_s26 = sadd.s32 1, %s2422_s11 }
  0x57   : > { %p54_p7 = scmp.ne.s32.totalorder %s2422_s11, %s2418_s10  ;;  %p55_p8 = scmp.eq.s32.totalorder %s2442_s16, 0 }
  0x58   : > { %s2890_s25 = smov (%p38_p6, %s37_s25), 0  ;;  %s2892_s28 = smov (!%p38_p6, %s40_s28), %s2438_s15 }
  0x59   : > { %2865 = sst [smem:[#allocation22_spill]] %s2890_s25  ;;  %s44_s22 = ssub.s32 %s2434_s14, %s2890_s25 }
  0x5a   : > { %2068 = dma.hbm_to_vmem [thread:$0]  (!%p2572_p5), %s2864_s7, 6144, %s332_s17, [#allocation14], %s2453_s9, %s2453_s9, %s2454_s27  }
  0x5b   : > { %p2632_p5 = por %p55_p8, %p54_p7  ;;  %p42_p10 = scmp.ge.s32.totalorder %s2892_s28, 3 }
  0x5c   : > { %p45_p9 = scmp.eq.s32.totalorder %s44_s22, 0  ;;  %p60_p11 = scmp.ne.s32.totalorder %s2418_s10, %s2414_s30 }
  0x5d   : > { %s2867_s17 = sadd.s32 4294967295, %s2442_s16   ;;  %s2894_s28 = smov (%p42_p10, %s2892_s28), 0 }
  0x5e   : > { %p252_p1 = scmp.eq.s32.totalorder %s2867_s17, 5  ;;  %2868 = sst [smem:[#allocation23_spill]] %s2894_s28 }
  0x5f   : > { %s2643_s21 = scalar_select %p45_p9, %s2422_s11, %s47_s26  }
  0x60   : > { %p2869_p12 = scmp.ne.s32.totalorder %s2856_s18, 0  ;;  %p2654_p0 = por %p252_p1, %p54_p7 }
  0x61   : > { %p258_p2 = scmp.eq.s32.totalorder %s1839_s20, 5  ;;  %p2082_p3 = scmp.lt.s32.totalorder %s2442_s16, 6 }
  0x62   : > { %p2647_p13 = por %p2869_p12, %p60_p11  ;;  %s348_s24 = sand.u32 1, %s2422_s11  }
  0x63   : > { %s1848_s29 = sshll.u32 %s2434_s14, 7  ;;  %p2661_p4 = por %p258_p2, %p60_p11 }
  0x64   : > { %s1847_s26 = sshll.u32 %s348_s24, 3  ;;  %s357_s2 = scalar_lea.hbm %s2832_s0, %s1848_s29 }
  0x65   : > { %p2670_p6 = pnand %p2082_p3, %p2632_p5  ;;  %s352_s4 = scalar_lea.vmem [#allocation4], %s1847_s26 }
  0x66   : > { %s359_s20 = sshll.u32 %s352_s4, 4  ;;  %s349_s7 = scalar_lea.sflag [#allocation5], %s348_s24  ;;  %s360_s20 = int_to_ptr.vmem [resolvable:$true] %s359_s20 }
  0x67   : > { %p2308_p7 = pneg %p2670_p6  ;;  %s2319_s28 = scalar_lea.vmem %s360_s20, 128 }
  0x68   : > { %p2320_p8 = scmp.ne.s32.totalorder %s360_s20, %s2319_s28  ;;  %s2455_s25 = smov [#allocation4]  }
  0x69   : > { %s2324_s15 = sshll.u32 %s2455_s25, 4  ;;  %s2325_s15 = int_to_ptr.vmem [resolvable:$false] %s2324_s15 }
  0x6a   : > { %p2322_p10 = pnand %p2320_p8, %p2308_p7  ;;  %s2326_s1 = scalar_lea.vmem %s2325_s15, 256 }
  0x6b   : > { %p2327_p11 = scmp.lt.s32.totalorder %s360_s20, %s2325_s15  ;;  %p2328_p5 = scmp.lt.s32.totalorder %s2326_s1, %s2319_s28 }
  0x6c   : > { %p2323_p9 = pneg %p2322_p10 }
  0x6d   : > { %p2329_p1 = por %p2328_p5, %p2327_p11 }
  0x6f   : > { %p2330_p12 = pnand %p2329_p1, %p2323_p9 }
  0x71   : > { %2333 = shalt.err (!%p2330_p12)
}
  0x72   : > { %2072 = dma.hbm_to_vmem [thread:$0]  (!%p2670_p6), %s357_s2, 128, %s360_s20, %s349_s7  }
  0x73   : > { %p2874_p2 = scmp.ne.s32.totalorder %s2857_s19, 0 }
  0x74   : > { %s2681_s4 = sand.u32 (!%p2874_p2), 1, %s2418_s10  }
  0x75   : > { %368 = sbr.rel (%p2874_p2) target bundleno = 1524 (0x5f4), region = 56  ;;  %s1850_s25 = sshll.u32 (!%p2874_p2), %s2681_s4, 3 }
  0x76   : > { %s371_s23 = scalar_lea.sflag (!%p2874_p2), [#allocation5], %s2681_s4  ;;  %s2685_s24 = scalar_lea.vmem (!%p2874_p2), [#allocation4], %s1850_s25 }
  0x7a   : > { %2393 = dma.done.wait (%p2647_p13), %s371_s23, 128  }
  0x7b   : > { %2395 = vsyncadd (%p2647_p13), %s371_s23, 4294967168  ;;  %p2875_p3 = scmp.ne.s32.totalorder %s2856_s18, 0 }
  0x7d   : > { %2397 = dma.done.wait (%p2875_p3), [#allocation8], 1056  }
  0x7e   : > { %2399 = vsyncadd (%p2875_p3), [#allocation8], 4294966240 }
  0x7f   : > { %2401 = dma.done.wait (%p2875_p3), [#allocation11], 12320  }
  0x80   : > { %2403 = vsyncadd (%p2875_p3), [#allocation11], 4294954976 }
  0x81   : > { %2405 = dma.done.wait (%p2875_p3), [#allocation14], 6144  }
  0x82   : > { %2407 = vsyncadd (%p2875_p3), [#allocation14], 4294961152  ;;  %s2703_s2 = scalar_lea.vmem [#allocation15], %s1850_s25  ;;  %p1857_p13 = scmp.ne.s32.totalorder %s2430_s13, 0 }
  0x83   : > { %p1858_p6 = scmp.ne.s32.totalorder (!%p1857_p13), %s2426_s12, 0 }
  0x84   : > { %432 = sbr.rel (%p1857_p13) target bundleno = 405 (0x195), region = 84 }
  0x89   : > { %436 = sbr.rel (%p1858_p6) target bundleno = 144 (0x90), region = 88 }
  0x8e   : > { %v2456_v0 = vmov 0.0  }
  0x8f   : > { %437 = vst [vmem:[#allocation2] sm:$0xff] %v2456_v0 }
  0x90 PF: > { %v446_v1 = vld [vmem:[#allocation7 + $0x38] sm:$0xff]  ;;  %v445_v2 = vld [vmem:[#allocation7 + $0x30] sm:$0xff]  ;;  %v444_v3 = vld [vmem:[#allocation7 + $0x28] sm:$0xff]  ;;  %v2457_v5 = vmov 0.0   ;;  %vm447_vm0 = vcmask 261120   ;;  %v541_v21 = vlaneseq  ;;  %p1860_p7 = scmp.ne.s32.totalorder %s2426_s12, 1 }
  0x91   : > { %475 = vmatprep.subr.mxu0 %v446_v1  ;;  %v443_v4 = vld [vmem:[#allocation7 + $0x20] sm:$0xff]  ;;  %515 = vmatprep.mubr.f32.mxu0 %v2457_v5  ;;  %v442_v6 = vld [vmem:[#allocation7 + $0x18] sm:$0xff]  ;;  %v441_v7 = vld [vmem:[#allocation7 + $0x10] sm:$0xff]  ;;  %v2458_v19 = vmov 1966171168  }
  0x92   : > { %476 = vmatpush1.msra.mxu0 %v445_v2  ;;  %v440_v8 = vld [vmem:[#allocation7 + $0x8] sm:$0xff]  ;;  %v439_v9 = vld [vmem:[#allocation7] sm:$0xff]  ;;  %v438_v10 = vld [vmem:[%s2685_s24] sm:$0xff]  ;;  %v539_v20 = vunpack.c.l.s4 %v2458_v19  ;;  %v542_v31 = vshrl.u32 %v541_v21, 7  ;;  %vm2708_vm1 = vcmp.lt.s32.totalorder %v541_v21, 256 }
  0x93   : > { %477 = vmatprep.subr.mxu0 %v444_v3 }
  0x94   : > { %478 = vmatpush1.msra.mxu0 %v443_v4  ;;  %v540_v30 = vunpack.c.0.s8 %v539_v20 }
  0x95   : > { %479 = vmatprep.subr.mxu0 %v442_v6 }
  0x96   : > { %480 = vmatpush1.msra.mxu0 %v441_v7  ;;  %v543_v41 = vsub.s32 %v540_v30, %v542_v31  ;;  %v522_v48 = vld [vmem:[#allocation2] ss:$4 sm:$0x3]  ;;  %v560_v52 = vld [vmem:[#allocation2 + $0x1] ss:$4 sm:$0x3] }
  0x97   : > { %481 = vmatprep.subr.mxu0 %v440_v8 }
  0x98   : > { %482 = vmatpush1.msra.mxu0 %v439_v9 }
  0x99   : > { %1859 = vmatmul.mubr.msk.f32.vlgmr.msra.gmra.mxu0 %vm447_vm0, %v438_v10 }
 0x159   : > { %v517_v11 = vpop.f32.mrf.mxu0 }
 0x15a   : > { %v523_v12 = vrot.slane %v517_v11, 4  ;;  %v561_v13 = vmul.f32 %v517_v11, %v517_v11 }
 0x15b   : > { %v519_v14 = vpop.f32.mrf.mxu0 }
 0x15c   : > { %v524_v15 = vadd.f32 %v523_v12, %v517_v11  ;;  %v563_v16 = vrot.slane %v561_v13, 4  ;;  %v529_v17 = vrot.slane %v519_v14, 4  ;;  %v562_v18 = vmul.f32 %v519_v14, %v519_v14 }
 0x15e   : > { %v525_v22 = vrot.slane %v524_v15, 2  ;;  %v564_v23 = vadd.f32 %v563_v16, %v561_v13  ;;  %v530_v24 = vadd.f32 %v529_v17, %v519_v14  ;;  %v569_v25 = vrot.slane %v562_v18, 4 }
 0x160   : > { %v526_v26 = vadd.f32 %v525_v22, %v524_v15  ;;  %v565_v27 = vrot.slane %v564_v23, 2  ;;  %v531_v28 = vrot.slane %v530_v24, 2  ;;  %v570_v29 = vadd.f32 %v569_v25, %v562_v18 }
 0x162   : > { %v527_v32 = vrot.slane %v526_v26, 1  ;;  %v566_v33 = vadd.f32 %v565_v27, %v564_v23  ;;  %v532_v34 = vadd.f32 %v531_v28, %v530_v24  ;;  %v571_v35 = vrot.slane %v570_v29, 2 }
 0x164   : > { %v567_v36 = vrot.slane %v566_v33, 1  ;;  %v533_v37 = vrot.slane %v532_v34, 1  ;;  %v572_v38 = vadd.f32 %v571_v35, %v570_v29  ;;  %v528_v39 = vadd.f32 %v527_v32, %v526_v26 }
 0x166   : > { %v534_v40 = vadd.f32 %v533_v37, %v532_v34  ;;  %v573_v42 = vrot.slane %v572_v38, 1  ;;  %v568_v43 = vadd.f32 %v567_v36, %v566_v33 }
 0x168   : > { %v537_v44 = vcombine.low %v528_v39, %v534_v40  ;;  %v574_v45 = vadd.f32 %v573_v42, %v572_v38 }
 0x16a   : > { %v544_v46 = vrot.slane %v537_v44, %v543_v41  ;;  %v577_v47 = vcombine.low %v568_v43, %v574_v45 }
 0x16c   : > { %v551_v49 = vrot.slane %v544_v46, %v543_v41  ;;  %v584_v50 = vrot.slane %v577_v47, %v543_v41 }
 0x16e   : > { %v553_v53 = vadd.f32 %v551_v49, %v522_v48  ;;  %v591_v54 = vrot.slane %v584_v50, %v543_v41  ;;  %598 = sbr.rel (%p1860_p7) target bundleno = 405 (0x195), region = 92 }
 0x170   : > { %558 = vst.msk [vmem:[#allocation2] ss:$4 sm:$0x3] %vm2708_vm1, %v553_v53  ;;  %v593_v55 = vadd.f32 %v591_v54, %v560_v52 }
 0x172   : > { %594 = vst.msk [vmem:[#allocation2 + $0x1] ss:$4 sm:$0x3] %vm2708_vm1, %v593_v55 }
 0x173   : > { %v605_v63 = vld [vmem:[#allocation9] sm:$0x3]  ;;  %v611_v2 = vld [vmem:[#allocation10] sm:$0x3] }
 0x177   : > { %v599_v56 = vld [vmem:[#allocation2] ss:$4 sm:$0x3] }
 0x178   : > { %v600_v58 = vmul.f32 0.0625, %v599_v56 }
 0x179   : > { %v601_v57 = vld [vmem:[#allocation2 + $0x1] ss:$4 sm:$0x3] }
 0x17a   : > { %v602_v59 = vmul.f32 0.0625, %v601_v57  ;;  %v603_v60 = vmul.f32 %v600_v58, %v600_v58 }
 0x17c   : > { %v604_v61 = vsub.f32 %v602_v59, %v603_v60 }
 0x17e   : > { %v606_v62 = vadd.f32 1e-05, %v604_v61 }
 0x180   : > { %2172 = vrsqrt.f32 %v606_v62 }
 0x18d   : > { %v2173_v0 = vpop.eup %2172 }
 0x18e   : > { %v608_v1 = vmul.f32 %v2173_v0, %v605_v63 }
 0x190   : > { %610 = vst.msk [vmem:[#allocation2 + $0x2] ss:$4 sm:$0x3] %vm2708_vm1, %v608_v1  ;;  %v612_v3 = vmul.f32 %v608_v1, %v600_v58 }
 0x192   : > { %v613_v4 = vsub.f32 %v611_v2, %v612_v3 }
 0x194   : > { %615 = vst.msk [vmem:[#allocation2 + $0x3] ss:$4 sm:$0x3] %vm2708_vm1, %v613_v4 }
 0x195 PF: > { %p1861_p8 = scmp.ne.s32.totalorder %s2430_s13, 1 }
 0x196   : > { %p1862_p10 = scmp.ne.s32.totalorder (!%p1861_p8), %s2426_s12, 0 }
 0x197   : > { %619 = sbr.rel (%p1861_p8) target bundleno = 883 (0x373), region = 96 }
 0x19c   : > { %623 = sbr.rel (%p1862_p10) target bundleno = 419 (0x1a3), region = 100 }
 0x1a1   : > { %v2459_v5 = vmov 0.0  }
 0x1a2   : > { %624 = vst [vmem:[#allocation3] sm:$0xff] %v2459_v5  ;;  %625 = vst [vmem:[#allocation3 + $0x8] sm:$0xf] %v2459_v5 }
 0x1a3 PF: > { %v634_v6 = vld [vmem:[#allocation7 + $0x38] sm:$0xff]  ;;  %v633_v7 = vld [vmem:[#allocation7 + $0x30] sm:$0xff]  ;;  %v632_v8 = vld [vmem:[#allocation7 + $0x28] sm:$0xff]  ;;  %v2460_v10 = vmov 0.0   ;;  %vm635_vm2 = vcmask 261120   ;;  %p1864_p9 = scmp.ne.s32.totalorder %s2426_s12, 1 }
 0x1a4   : > { %663 = vmatprep.subr.mxu0 %v634_v6  ;;  %v631_v9 = vld [vmem:[#allocation7 + $0x20] sm:$0xff]  ;;  %703 = vmatprep.mubr.f32.mxu0 %v2460_v10  ;;  %v630_v11 = vld [vmem:[#allocation7 + $0x18] sm:$0xff]  ;;  %v629_v12 = vld [vmem:[#allocation7 + $0x10] sm:$0xff] }
 0x1a5   : > { %664 = vmatpush1.msra.mxu0 %v633_v7  ;;  %v786_v13 = vld [vmem:[#allocation12 + $0x170] sm:$0xff]  ;;  %v785_v14 = vld [vmem:[#allocation12 + $0x168] sm:$0xff]  ;;  %v783_v15 = vld [vmem:[#allocation12 + $0x158] sm:$0xff] }
 0x1a6   : > { %665 = vmatprep.subr.mxu0 %v632_v8  ;;  %v628_v16 = vld [vmem:[#allocation7 + $0x8] sm:$0xff]  ;;  %836 = vmatprep.subr.mxu1 %v786_v13  ;;  %v782_v17 = vld [vmem:[#allocation12 + $0x150] sm:$0xff]  ;;  %v627_v18 = vld [vmem:[#allocation7] sm:$0xff] }
 0x1a7   : > { %666 = vmatpush1.msra.mxu0 %v631_v9  ;;  %837 = vmatpush1.msra.mxu1 %v785_v14  ;;  %v780_v19 = vld [vmem:[#allocation12 + $0x140] sm:$0xff]  ;;  %v626_v20 = vld [vmem:[%s2685_s24] sm:$0xff] }
 0x1a8   : > { %667 = vmatprep.subr.mxu0 %v630_v11  ;;  %838 = vmatprep.subr.mxu1 %v783_v15  ;;  %v779_v21 = vld [vmem:[#allocation12 + $0x138] sm:$0xff]  ;;  %v777_v22 = vld [vmem:[#allocation12 + $0x128] sm:$0xff]  ;;  %v776_v23 = vld [vmem:[#allocation12 + $0x120] sm:$0xff] }
 0x1a9   : > { %668 = vmatpush1.msra.mxu0 %v629_v12  ;;  %839 = vmatpush1.msra.mxu1 %v782_v17  ;;  %v774_v24 = vld [vmem:[#allocation12 + $0x110] sm:$0xff]  ;;  %v773_v25 = vld [vmem:[#allocation12 + $0x108] sm:$0xff]  ;;  %v771_v26 = vld [vmem:[#allocation12 + $0xf8] sm:$0xff] }
 0x1aa   : > { %669 = vmatprep.subr.mxu0 %v628_v16  ;;  %840 = vmatprep.subr.mxu1 %v780_v19  ;;  %v770_v27 = vld [vmem:[#allocation12 + $0xf0] sm:$0xff]  ;;  %v768_v28 = vld [vmem:[#allocation12 + $0xe0] sm:$0xff]  ;;  %v767_v29 = vld [vmem:[#allocation12 + $0xd8] sm:$0xff] }
 0x1ab   : > { %670 = vmatpush1.msra.mxu0 %v627_v18  ;;  %841 = vmatpush1.msra.mxu1 %v779_v21  ;;  %v835_v30 = vld [vmem:[#allocation12 + $0x2f8] sm:$0xff]  ;;  %v765_v32 = vld [vmem:[#allocation12 + $0xc8] sm:$0xff]  ;;  %v832_v33 = vld [vmem:[#allocation12 + $0x2e0] sm:$0xff] }
 0x1ac   : > { %1863 = vmatmul.mubr.msk.f32.vlgmr.msra.gmra.mxu0 %vm635_vm2, %v626_v20  ;;  %842 = vmatprep.subr.mxu1 %v777_v22  ;;  %v787_v31 = vld [vmem:[#allocation12 + $0x178] sm:$0xff]  ;;  %v764_v34 = vld [vmem:[#allocation12 + $0xc0] sm:$0xff]  ;;  %v829_v36 = vld [vmem:[#allocation12 + $0x2c8] sm:$0xff] }
 0x1ad   : > { %843 = vmatpush1.msra.mxu1 %v776_v23  ;;  %1872 = vmatprep.subr.mxu0 %v835_v30  ;;  %v784_v35 = vld [vmem:[#allocation12 + $0x160] sm:$0xff]  ;;  %v762_v37 = vld [vmem:[#allocation12 + $0xb0] sm:$0xff]  ;;  %v781_v38 = vld [vmem:[#allocation12 + $0x148] sm:$0xff] }
 0x1ae   : > { %844 = vmatprep.subr.mxu1 %v774_v24  ;;  %1873 = vmatpush3.msra.mxu0 %v787_v31  ;;  %v761_v39 = vld [vmem:[#allocation12 + $0xa8] sm:$0xff]  ;;  %v826_v40 = vld [vmem:[#allocation12 + $0x2b0] sm:$0xff]  ;;  %v759_v41 = vld [vmem:[#allocation12 + $0x98] sm:$0xff] }
 0x1af   : > { %845 = vmatpush1.msra.mxu1 %v773_v25  ;;  %1874 = vmatprep.subr.mxu0 %v832_v33  ;;  %v778_v42 = vld [vmem:[#allocation12 + $0x130] sm:$0xff]  ;;  %v823_v44 = vld [vmem:[#allocation12 + $0x298] sm:$0xff]  ;;  %v756_v45 = vld [vmem:[#allocation12 + $0x80] sm:$0xff] }
 0x1b0   : > { %846 = vmatprep.subr.mxu1 %v771_v26  ;;  %1875 = vmatpush3.msra.mxu0 %v784_v35  ;;  %v758_v43 = vld [vmem:[#allocation12 + $0x90] sm:$0xff]  ;;  %v775_v46 = vld [vmem:[#allocation12 + $0x118] sm:$0xff]  ;;  %v820_v48 = vld [vmem:[#allocation12 + $0x280] sm:$0xff] }
 0x1b1   : > { %847 = vmatpush1.msra.mxu1 %v770_v27  ;;  %1876 = vmatprep.subr.mxu0 %v829_v36  ;;  %v755_v47 = vld [vmem:[#allocation12 + $0x78] sm:$0xff]  ;;  %v753_v49 = vld [vmem:[#allocation12 + $0x68] sm:$0xff]  ;;  %v772_v50 = vld [vmem:[#allocation12 + $0x100] sm:$0xff] }
 0x1b2   : > { %848 = vmatprep.subr.mxu1 %v768_v28  ;;  %1877 = vmatpush3.msra.mxu0 %v781_v38  ;;  %v752_v51 = vld [vmem:[#allocation12 + $0x60] sm:$0xff]  ;;  %v817_v52 = vld [vmem:[#allocation12 + $0x268] sm:$0xff]  ;;  %v750_v53 = vld [vmem:[#allocation12 + $0x50] sm:$0xff] }
 0x1b3   : > { %849 = vmatpush1.msra.mxu1 %v767_v29  ;;  %1878 = vmatprep.subr.mxu0 %v826_v40  ;;  %v769_v54 = vld [vmem:[#allocation12 + $0xe8] sm:$0xff]  ;;  %v814_v56 = vld [vmem:[#allocation12 + $0x250] sm:$0xff]  ;;  %v747_v57 = vld [vmem:[#allocation12 + $0x38] sm:$0xff] }
 0x1b4   : > { %850 = vmatprep.subr.mxu1 %v765_v32  ;;  %1879 = vmatpush3.msra.mxu0 %v778_v42  ;;  %v749_v55 = vld [vmem:[#allocation12 + $0x48] sm:$0xff]  ;;  %v766_v58 = vld [vmem:[#allocation12 + $0xd0] sm:$0xff]  ;;  %v811_v60 = vld [vmem:[#allocation12 + $0x238] sm:$0xff] }
 0x1b5   : > { %851 = vmatpush1.msra.mxu1 %v764_v34  ;;  %1880 = vmatprep.subr.mxu0 %v823_v44  ;;  %v746_v59 = vld [vmem:[#allocation12 + $0x30] sm:$0xff]  ;;  %v744_v61 = vld [vmem:[#allocation12 + $0x20] sm:$0xff]  ;;  %v763_v62 = vld [vmem:[#allocation12 + $0xb8] sm:$0xff] }
 0x1b6   : > { %852 = vmatprep.subr.mxu1 %v762_v37  ;;  %1881 = vmatpush3.msra.mxu0 %v775_v46  ;;  %v743_v63 = vld [vmem:[#allocation12 + $0x18] sm:$0xff]  ;;  %v808_v0 = vld [vmem:[#allocation12 + $0x220] sm:$0xff]  ;;  %v741_v1 = vld [vmem:[#allocation12 + $0x8] sm:$0xff] }
 0x1b7   : > { %853 = vmatpush1.msra.mxu1 %v761_v39  ;;  %1882 = vmatprep.subr.mxu0 %v820_v48  ;;  %v760_v2 = vld [vmem:[#allocation12 + $0xa0] sm:$0xff]  ;;  %v805_v4 = vld [vmem:[#allocation12 + $0x208] sm:$0xff]  ;;  %v834_v5 = vld [vmem:[#allocation12 + $0x2f0] sm:$0xff]  ;;  %v713_v48 = vlaneseq }
 0x1b8   : > { %854 = vmatprep.subr.mxu1 %v759_v41  ;;  %1883 = vmatpush3.msra.mxu0 %v772_v50  ;;  %v740_v3 = vld [vmem:[#allocation12] sm:$0xff]  ;;  %v757_v6 = vld [vmem:[#allocation12 + $0x88] sm:$0xff]  ;;  %v802_v8 = vld [vmem:[#allocation12 + $0x1f0] sm:$0xff] }
 0x1b9   : > { %855 = vmatpush1.msra.mxu1 %v758_v43  ;;  %1884 = vmatprep.subr.mxu0 %v817_v52  ;;  %v833_v7 = vld [vmem:[#allocation12 + $0x2e8] sm:$0xff]  ;;  %v831_v9 = vld [vmem:[#allocation12 + $0x2d8] sm:$0xff]  ;;  %v754_v10 = vld [vmem:[#allocation12 + $0x70] sm:$0xff]  ;;  %vm2726_vm3 = vcmp.lt.s32.totalorder %v713_v48, 384 }
 0x1ba   : > { %856 = vmatprep.subr.mxu1 %v756_v45  ;;  %1885 = vmatpush3.msra.mxu0 %v769_v54  ;;  %v830_v11 = vld [vmem:[#allocation12 + $0x2d0] sm:$0xff]  ;;  %v828_v12 = vld [vmem:[#allocation12 + $0x2c0] sm:$0xff]  ;;  %v827_v13 = vld [vmem:[#allocation12 + $0x2b8] sm:$0xff] }
 0x1bb   : > { %857 = vmatpush1.msra.mxu1 %v755_v47  ;;  %1886 = vmatprep.subr.mxu0 %v814_v56  ;;  %v825_v14 = vld [vmem:[#allocation12 + $0x2a8] sm:$0xff]  ;;  %v824_v15 = vld [vmem:[#allocation12 + $0x2a0] sm:$0xff]  ;;  %v822_v16 = vld [vmem:[#allocation12 + $0x290] sm:$0xff] }
 0x1bc   : > { %858 = vmatprep.subr.mxu1 %v753_v49  ;;  %1887 = vmatpush3.msra.mxu0 %v766_v58  ;;  %v821_v17 = vld [vmem:[#allocation12 + $0x288] sm:$0xff]  ;;  %v819_v18 = vld [vmem:[#allocation12 + $0x278] sm:$0xff]  ;;  %v818_v19 = vld [vmem:[#allocation12 + $0x270] sm:$0xff]  ;;  %v714_v49 = vshrl.u32 %v713_v48, 7 }
 0x1bd   : > { %859 = vmatpush1.msra.mxu1 %v752_v51  ;;  %1888 = vmatprep.subr.mxu0 %v811_v60  ;;  %v816_v20 = vld [vmem:[#allocation12 + $0x260] sm:$0xff]  ;;  %v815_v21 = vld [vmem:[#allocation12 + $0x258] sm:$0xff]  ;;  %v813_v22 = vld [vmem:[#allocation12 + $0x248] sm:$0xff] }
 0x1be   : > { %860 = vmatprep.subr.mxu1 %v750_v53  ;;  %1889 = vmatpush3.msra.mxu0 %v763_v62  ;;  %v812_v23 = vld [vmem:[#allocation12 + $0x240] sm:$0xff]  ;;  %v810_v24 = vld [vmem:[#allocation12 + $0x230] sm:$0xff]  ;;  %v809_v25 = vld [vmem:[#allocation12 + $0x228] sm:$0xff]  ;;  %v715_v50 = vsub.s32 0, %v714_v49  ;;  %v719_v52 = vsub.s32 1, %v714_v49 }
 0x1bf   : > { %861 = vmatpush1.msra.mxu1 %v749_v55  ;;  %1890 = vmatprep.subr.mxu0 %v808_v0  ;;  %v807_v26 = vld [vmem:[#allocation12 + $0x218] sm:$0xff]  ;;  %v806_v27 = vld [vmem:[#allocation12 + $0x210] sm:$0xff]  ;;  %v804_v28 = vld [vmem:[#allocation12 + $0x200] sm:$0xff] }
 0x1c0   : > { %862 = vmatprep.subr.mxu1 %v747_v57  ;;  %1891 = vmatpush3.msra.mxu0 %v760_v2  ;;  %v803_v29 = vld [vmem:[#allocation12 + $0x1f8] sm:$0xff]  ;;  %v801_v30 = vld [vmem:[#allocation12 + $0x1e8] sm:$0xff]  ;;  %v800_v31 = vld [vmem:[#allocation12 + $0x1e0] sm:$0xff] }
 0x1c1   : > { %863 = vmatpush1.msra.mxu1 %v746_v59  ;;  %1892 = vmatprep.subr.mxu0 %v805_v4  ;;  %v798_v32 = vld [vmem:[#allocation12 + $0x1d0] sm:$0xff]  ;;  %v799_v33 = vld [vmem:[#allocation12 + $0x1d8] sm:$0xff]  ;;  %v797_v34 = vld [vmem:[#allocation12 + $0x1c8] sm:$0xff] }
 0x1c2   : > { %864 = vmatprep.subr.mxu1 %v744_v61  ;;  %1893 = vmatpush3.msra.mxu0 %v757_v6  ;;  %v751_v35 = vld [vmem:[#allocation12 + $0x58] sm:$0xff]  ;;  %v796_v37 = vld [vmem:[#allocation12 + $0x1c0] sm:$0xff]  ;;  %v794_v38 = vld [vmem:[#allocation12 + $0x1b0] sm:$0xff] }
 0x1c3   : > { %865 = vmatpush1.msra.mxu1 %v743_v63  ;;  %1894 = vmatprep.subr.mxu0 %v802_v8  ;;  %v795_v36 = vld [vmem:[#allocation12 + $0x1b8] sm:$0xff]  ;;  %v748_v39 = vld [vmem:[#allocation12 + $0x40] sm:$0xff]  ;;  %v793_v41 = vld [vmem:[#allocation12 + $0x1a8] sm:$0xff] }
 0x1c4   : > { %866 = vmatprep.subr.mxu1 %v741_v1  ;;  %1895 = vmatpush3.msra.mxu0 %v754_v10  ;;  %v792_v40 = vld [vmem:[#allocation12 + $0x1a0] sm:$0xff]  ;;  %v791_v42 = vld [vmem:[#allocation12 + $0x198] sm:$0xff]  ;;  %v745_v43 = vld [vmem:[#allocation12 + $0x28] sm:$0xff]  ;;  %v2461_v10 = vmov 1966171168  }
 0x1c5   : > { %867 = vmatpush1.msra.mxu1 %v740_v3  ;;  %1896 = vmatprep.subr.mxu0 %v799_v33  ;;  %v789_v44 = vld [vmem:[#allocation12 + $0x188] sm:$0xff]  ;;  %v790_v45 = vld [vmem:[#allocation12 + $0x190] sm:$0xff]  ;;  %v788_v46 = vld [vmem:[#allocation12 + $0x180] sm:$0xff] }
 0x1c6   : > { %868 = vmatprep.subr.mxu1 %v834_v5  ;;  %1897 = vmatpush3.msra.mxu0 %v751_v35  ;;  %v742_v47 = vld [vmem:[#allocation12 + $0x10] sm:$0xff]  ;;  %v711_v51 = vld [vmem:[#allocation2 + $0x2] ss:$4 sm:$0x3] }
 0x1c7   : > { %869 = vmatpush2.msra.mxu1 %v833_v7  ;;  %1898 = vmatprep.subr.mxu0 %v796_v37  ;;  %v716_v53 = vrot.slane %v711_v51, %v715_v50  ;;  %v726_v54 = vld [vmem:[#allocation2 + $0x3] ss:$4 sm:$0x3]  ;;  %v720_v55 = vrot.slane %v711_v51, %v719_v52 }
 0x1c8   : > { %870 = vmatprep.subr.mxu1 %v831_v9  ;;  %1899 = vmatpush3.msra.mxu0 %v748_v39  ;;  %v735_v57 = vrot.slane %v726_v54, %v719_v52  ;;  %v731_v59 = vrot.slane %v726_v54, %v715_v50 }
 0x1c9   : > { %871 = vmatpush2.msra.mxu1 %v830_v11  ;;  %1900 = vmatprep.subr.mxu0 %v793_v41  ;;  %v1001_v11 = vunpack.c.l.s4 %v2461_v10 }
 0x1ca   : > { %872 = vmatprep.subr.mxu1 %v828_v12  ;;  %1901 = vmatpush3.msra.mxu0 %v745_v43 }
 0x1cb   : > { %873 = vmatpush2.msra.mxu1 %v827_v13  ;;  %1902 = vmatprep.subr.mxu0 %v790_v45 }
 0x1cc   : > { %874 = vmatprep.subr.mxu1 %v825_v14  ;;  %1903 = vmatpush3.msra.mxu0 %v742_v47 }
 0x1cd   : > { %875 = vmatpush2.msra.mxu1 %v824_v15 }
 0x1ce   : > { %876 = vmatprep.subr.mxu1 %v822_v16 }
 0x1cf   : > { %877 = vmatpush2.msra.mxu1 %v821_v17 }
 0x1d0   : > { %878 = vmatprep.subr.mxu1 %v819_v18 }
 0x1d1   : > { %879 = vmatpush2.msra.mxu1 %v818_v19 }
 0x1d2   : > { %880 = vmatprep.subr.mxu1 %v816_v20 }
 0x1d3   : > { %881 = vmatpush2.msra.mxu1 %v815_v21 }
 0x1d4   : > { %882 = vmatprep.subr.mxu1 %v813_v22 }
 0x1d5   : > { %883 = vmatpush2.msra.mxu1 %v812_v23  ;;  %v1002_v23 = vunpack.c.0.s8 %v1001_v11 }
 0x1d6   : > { %884 = vmatprep.subr.mxu1 %v810_v24 }
 0x1d7   : > { %885 = vmatpush2.msra.mxu1 %v809_v25  ;;  %v1005_v37 = vsub.s32 %v1002_v23, %v714_v49 }
 0x1d8   : > { %886 = vmatprep.subr.mxu1 %v807_v26 }
 0x1d9   : > { %887 = vmatpush2.msra.mxu1 %v806_v27 }
 0x1da   : > { %888 = vmatprep.subr.mxu1 %v804_v28 }
 0x1db   : > { %889 = vmatpush2.msra.mxu1 %v803_v29 }
 0x1dc   : > { %890 = vmatprep.subr.mxu1 %v801_v30 }
 0x1dd   : > { %891 = vmatpush2.msra.mxu1 %v800_v31 }
 0x1de   : > { %892 = vmatprep.subr.mxu1 %v798_v32 }
 0x1df   : > { %893 = vmatpush2.msra.mxu1 %v797_v34 }
 0x1e0   : > { %894 = vmatprep.subr.mxu1 %v795_v36 }
 0x1e1   : > { %895 = vmatpush2.msra.mxu1 %v794_v38 }
 0x1e2   : > { %896 = vmatprep.subr.mxu1 %v792_v40 }
 0x1e3   : > { %897 = vmatpush2.msra.mxu1 %v791_v42 }
 0x1e4   : > { %898 = vmatprep.subr.mxu1 %v789_v44 }
 0x1e5   : > { %899 = vmatpush2.msra.mxu1 %v788_v46 }
 0x26c   : > { %v705_v56 = vpop.f32.mrf.mxu0 }
 0x26d   : > { %v723_v58 = vmul.f32 %v716_v53, %v705_v56 }
 0x26e   : > { %v707_v60 = vpop.f32.mrf.mxu0 }
 0x26f   : > { %v724_v61 = vmul.f32 %v720_v55, %v707_v60  ;;  %v738_v63 = vadd.f32 %v731_v59, %v723_v58  ;;  %v1030_v60 = vld [vmem:[#allocation3 + $0x1] ss:$4 sm:$0x7] }
 0x271   : > { %v739_v62 = vadd.f32 %v735_v57, %v724_v61  ;;  %v977_v57 = vld [vmem:[#allocation3] ss:$4 sm:$0x7] }
 0x273   : > { %900 = vmatprep.mubr.f32.mxu1 %v739_v62  ;;  %971 = vmatprep.mubr.f32.mxu0 %v739_v62 }
 0x274   : > { %901 = vmatmul.mubr.f32.vlgmr.msra.gmra.mxu1 %v738_v63  ;;  %972 = vmatmul.mubr.f32.vlgmr.msra.gmra.mxu0 %v738_v63 }
 0x334   : > { %v902_v0 = vpop.f32.mrf.mxu1  ;;  %v1904_v1 = vpop.f32.mrf.mxu0 }
 0x335   : > { %v978_v2 = vrot.slane %v902_v0, 4  ;;  %v1031_v3 = vmul.f32 %v902_v0, %v902_v0 }
 0x336   : > { %v904_v4 = vpop.f32.mrf.mxu1  ;;  %v1905_v5 = vpop.f32.mrf.mxu0 }
 0x337   : > { %v979_v6 = vadd.f32 %v978_v2, %v902_v0  ;;  %v1034_v7 = vrot.slane %v1031_v3, 4  ;;  %v984_v8 = vrot.slane %v904_v4, 4  ;;  %v1032_v9 = vmul.f32 %v904_v4, %v904_v4 }
 0x338   : > { %v1906_v12 = vadd.f32 %v1905_v5, %v1904_v1 }
 0x339   : > { %v980_v13 = vrot.slane %v979_v6, 2  ;;  %v1035_v14 = vadd.f32 %v1034_v7, %v1031_v3  ;;  %v985_v15 = vadd.f32 %v984_v8, %v904_v4  ;;  %v1040_v16 = vrot.slane %v1032_v9, 4 }
 0x33a   : > { %v990_v17 = vrot.slane %v1906_v12, 4  ;;  %v1033_v18 = vmul.f32 %v1906_v12, %v1906_v12 }
 0x33b   : > { %v981_v19 = vadd.f32 %v980_v13, %v979_v6  ;;  %v1036_v20 = vrot.slane %v1035_v14, 2  ;;  %v986_v21 = vrot.slane %v985_v15, 2  ;;  %v1041_v22 = vadd.f32 %v1040_v16, %v1032_v9 }
 0x33c   : > { %v991_v24 = vadd.f32 %v1906_v12, %v990_v17  ;;  %v1046_v25 = vrot.slane %v1033_v18, 4 }
 0x33d   : > { %v982_v26 = vrot.slane %v981_v19, 1  ;;  %v1037_v27 = vadd.f32 %v1036_v20, %v1035_v14  ;;  %v987_v28 = vadd.f32 %v986_v21, %v985_v15  ;;  %v1042_v29 = vrot.slane %v1041_v22, 2 }
 0x33e   : > { %v992_v30 = vrot.slane %v991_v24, 2  ;;  %v1047_v31 = vadd.f32 %v1046_v25, %v1033_v18 }
 0x33f   : > { %v1038_v32 = vrot.slane %v1037_v27, 1  ;;  %v988_v33 = vrot.slane %v987_v28, 1  ;;  %v1043_v34 = vadd.f32 %v1042_v29, %v1041_v22  ;;  %v983_v38 = vadd.f32 %v982_v26, %v981_v19 }
 0x340   : > { %v993_v35 = vadd.f32 %v992_v30, %v991_v24  ;;  %v1048_v36 = vrot.slane %v1047_v31, 2 }
 0x341   : > { %v989_v39 = vadd.f32 %v988_v33, %v987_v28  ;;  %v1044_v40 = vrot.slane %v1043_v34, 1  ;;  %v1039_v43 = vadd.f32 %v1038_v32, %v1037_v27 }
 0x342   : > { %v994_v41 = vrot.slane %v993_v35, 1  ;;  %v1049_v42 = vadd.f32 %v1048_v36, %v1047_v31 }
 0x343   : > { %v999_v44 = vcombine.low %v983_v38, %v989_v39  ;;  %v1045_v45 = vadd.f32 %v1044_v40, %v1043_v34 }
 0x344   : > { %v995_v46 = vadd.f32 %v994_v41, %v993_v35  ;;  %v1050_v47 = vrot.slane %v1049_v42, 1 }
 0x345   : > { %v1006_v50 = vrot.slane %v999_v44, %v1005_v37  ;;  %v1055_v51 = vcombine.low %v1039_v43, %v1045_v45 }
 0x346   : > { %v1013_v52 = vrot.slane %v995_v46, %v1005_v37  ;;  %v1051_v53 = vadd.f32 %v1050_v47, %v1049_v42 }
 0x347   : > { %v1062_v54 = vrot.slane %v1055_v51, %v1005_v37 }
 0x348   : > { %v1014_v55 = vcombine.low %v1006_v50, %v1013_v52  ;;  %v1069_v56 = vrot.slane %v1051_v53, %v1005_v37 }
 0x34a   : > { %v1021_v58 = vrot.slane %v1014_v55, %v1005_v37  ;;  %v1070_v49 = vcombine.low %v1062_v54, %v1069_v56 }
 0x34c   : > { %v1023_v61 = vadd.f32 %v1021_v58, %v977_v57  ;;  %v1077_v62 = vrot.slane %v1070_v49, %v1005_v37  ;;  %1084 = sbr.rel (%p1864_p9) target bundleno = 883 (0x373), region = 104 }
 0x34e   : > { %1028 = vst.msk [vmem:[#allocation3] ss:$4 sm:$0x7] %vm2726_vm3, %v1023_v61  ;;  %v1079_v63 = vadd.f32 %v1077_v62, %v1030_v60 }
 0x350   : > { %1080 = vst.msk [vmem:[#allocation3 + $0x1] ss:$4 sm:$0x7] %vm2726_vm3, %v1079_v63 }
 0x351   : > { %v1091_v6 = vld [vmem:[%s2837_s5] sm:$0x7] }
 0x352   : > { %v1097_v9 = vld [vmem:[%s2838_s6] sm:$0x7] }
 0x355   : > { %v1085_v0 = vld [vmem:[#allocation3] ss:$4 sm:$0x7] }
 0x356   : > { %v1086_v2 = vmul.f32 0.0625, %v1085_v0 }
 0x357   : > { %v1087_v1 = vld [vmem:[#allocation3 + $0x1] ss:$4 sm:$0x7] }
 0x358   : > { %v1088_v48 = vmul.f32 0.0625, %v1087_v1  ;;  %v1089_v3 = vmul.f32 %v1086_v2, %v1086_v2 }
 0x35a   : > { %v1090_v4 = vsub.f32 %v1088_v48, %v1089_v3 }
 0x35c   : > { %v1092_v5 = vadd.f32 1e-05, %v1090_v4 }
 0x35e   : > { %2174 = vrsqrt.f32 %v1092_v5 }
 0x36b   : > { %v2175_v7 = vpop.eup %2174 }
 0x36c   : > { %v1094_v8 = vmul.f32 %v2175_v7, %v1091_v6 }
 0x36e   : > { %1096 = vst.msk [vmem:[#allocation3 + $0x2] ss:$4 sm:$0x7] %vm2726_vm3, %v1094_v8  ;;  %v1098_v10 = vmul.f32 %v1094_v8, %v1086_v2 }
 0x370   : > { %v1099_v11 = vsub.f32 %v1097_v9, %v1098_v10 }
 0x372   : > { %1101 = vst.msk [vmem:[#allocation3 + $0x3] ss:$4 sm:$0x7] %vm2726_vm3, %v1099_v11 }
 0x373 PF: > { %p1865_p11 = scmp.ne.s32.totalorder %s2430_s13, 2 }
 0x375   : > { %1105 = sbr.rel (%p1865_p11) target bundleno = 1501 (0x5dd), region = 108 }
 0x37a   : > { %v1114_v12 = vld [vmem:[#allocation7 + $0x38] sm:$0xff]  ;;  %v1113_v13 = vld [vmem:[#allocation7 + $0x30] sm:$0xff]  ;;  %v1112_v14 = vld [vmem:[#allocation7 + $0x28] sm:$0xff]  ;;  %v2462_v16 = vmov 0.0   ;;  %vm1115_vm4 = vcmask 261120   ;;  %vm2463_vm5 = vmmov 0  }
 0x37b   : > { %1143 = vmatprep.subr.mxu0 %v1114_v12  ;;  %v1111_v15 = vld [vmem:[#allocation7 + $0x20] sm:$0xff]  ;;  %1183 = vmatprep.mubr.f32.mxu0 %v2462_v16  ;;  %v1110_v17 = vld [vmem:[#allocation7 + $0x18] sm:$0xff]  ;;  %v1109_v18 = vld [vmem:[#allocation7 + $0x10] sm:$0xff] }
 0x37c   : > { %1144 = vmatpush1.msra.mxu0 %v1113_v13  ;;  %v1266_v19 = vld [vmem:[#allocation12 + $0x170] sm:$0xff]  ;;  %v1265_v20 = vld [vmem:[#allocation12 + $0x168] sm:$0xff]  ;;  %v1263_v21 = vld [vmem:[#allocation12 + $0x158] sm:$0xff] }
 0x37d   : > { %1145 = vmatprep.subr.mxu0 %v1112_v14  ;;  %v1108_v22 = vld [vmem:[#allocation7 + $0x8] sm:$0xff]  ;;  %1316 = vmatprep.subr.mxu1 %v1266_v19  ;;  %v1262_v23 = vld [vmem:[#allocation12 + $0x150] sm:$0xff]  ;;  %v1107_v24 = vld [vmem:[#allocation7] sm:$0xff] }
 0x37e   : > { %1146 = vmatpush1.msra.mxu0 %v1111_v15  ;;  %1317 = vmatpush1.msra.mxu1 %v1265_v20  ;;  %v1260_v25 = vld [vmem:[#allocation12 + $0x140] sm:$0xff]  ;;  %v1106_v26 = vld [vmem:[%s2685_s24] sm:$0xff] }
 0x37f   : > { %1147 = vmatprep.subr.mxu0 %v1110_v17  ;;  %1318 = vmatprep.subr.mxu1 %v1263_v21  ;;  %v1259_v27 = vld [vmem:[#allocation12 + $0x138] sm:$0xff]  ;;  %v1257_v28 = vld [vmem:[#allocation12 + $0x128] sm:$0xff]  ;;  %v1256_v29 = vld [vmem:[#allocation12 + $0x120] sm:$0xff] }
 0x380   : > { %1148 = vmatpush1.msra.mxu0 %v1109_v18  ;;  %1319 = vmatpush1.msra.mxu1 %v1262_v23  ;;  %v1254_v30 = vld [vmem:[#allocation12 + $0x110] sm:$0xff]  ;;  %v1253_v31 = vld [vmem:[#allocation12 + $0x108] sm:$0xff]  ;;  %v1251_v32 = vld [vmem:[#allocation12 + $0xf8] sm:$0xff] }
 0x381   : > { %1149 = vmatprep.subr.mxu0 %v1108_v22  ;;  %1320 = vmatprep.subr.mxu1 %v1260_v25  ;;  %v1250_v33 = vld [vmem:[#allocation12 + $0xf0] sm:$0xff]  ;;  %v1248_v34 = vld [vmem:[#allocation12 + $0xe0] sm:$0xff]  ;;  %v1247_v35 = vld [vmem:[#allocation12 + $0xd8] sm:$0xff] }
 0x382   : > { %1150 = vmatpush1.msra.mxu0 %v1107_v24  ;;  %1321 = vmatpush1.msra.mxu1 %v1259_v27  ;;  %v1315_v36 = vld [vmem:[#allocation12 + $0x2f8] sm:$0xff]  ;;  %v1245_v38 = vld [vmem:[#allocation12 + $0xc8] sm:$0xff]  ;;  %v1312_v39 = vld [vmem:[#allocation12 + $0x2e0] sm:$0xff] }
 0x383   : > { %1866 = vmatmul.mubr.msk.f32.vlgmr.msra.gmra.mxu0 %vm1115_vm4, %v1106_v26  ;;  %1322 = vmatprep.subr.mxu1 %v1257_v28  ;;  %v1267_v37 = vld [vmem:[#allocation12 + $0x178] sm:$0xff]  ;;  %v1244_v40 = vld [vmem:[#allocation12 + $0xc0] sm:$0xff]  ;;  %v1309_v42 = vld [vmem:[#allocation12 + $0x2c8] sm:$0xff] }
 0x384   : > { %1323 = vmatpush1.msra.mxu1 %v1256_v29  ;;  %1907 = vmatprep.subr.mxu0 %v1315_v36  ;;  %v1264_v41 = vld [vmem:[#allocation12 + $0x160] sm:$0xff]  ;;  %v1242_v43 = vld [vmem:[#allocation12 + $0xb0] sm:$0xff]  ;;  %v1261_v44 = vld [vmem:[#allocation12 + $0x148] sm:$0xff] }
 0x385   : > { %1324 = vmatprep.subr.mxu1 %v1254_v30  ;;  %1908 = vmatpush3.msra.mxu0 %v1267_v37  ;;  %v1241_v45 = vld [vmem:[#allocation12 + $0xa8] sm:$0xff]  ;;  %v1306_v46 = vld [vmem:[#allocation12 + $0x2b0] sm:$0xff]  ;;  %v1239_v47 = vld [vmem:[#allocation12 + $0x98] sm:$0xff] }
 0x386   : > { %1325 = vmatpush1.msra.mxu1 %v1253_v31  ;;  %1909 = vmatprep.subr.mxu0 %v1312_v39  ;;  %v1258_v50 = vld [vmem:[#allocation12 + $0x130] sm:$0xff]  ;;  %v1303_v52 = vld [vmem:[#allocation12 + $0x298] sm:$0xff]  ;;  %v1236_v53 = vld [vmem:[#allocation12 + $0x80] sm:$0xff] }
 0x387   : > { %1326 = vmatprep.subr.mxu1 %v1251_v32  ;;  %1910 = vmatpush3.msra.mxu0 %v1264_v41  ;;  %v1238_v51 = vld [vmem:[#allocation12 + $0x90] sm:$0xff]  ;;  %v1255_v54 = vld [vmem:[#allocation12 + $0x118] sm:$0xff]  ;;  %v1300_v56 = vld [vmem:[#allocation12 + $0x280] sm:$0xff] }
 0x388   : > { %1327 = vmatpush1.msra.mxu1 %v1250_v33  ;;  %1911 = vmatprep.subr.mxu0 %v1309_v42  ;;  %v1235_v55 = vld [vmem:[#allocation12 + $0x78] sm:$0xff]  ;;  %v1233_v57 = vld [vmem:[#allocation12 + $0x68] sm:$0xff]  ;;  %v1252_v58 = vld [vmem:[#allocation12 + $0x100] sm:$0xff] }
 0x389   : > { %1328 = vmatprep.subr.mxu1 %v1248_v34  ;;  %1912 = vmatpush3.msra.mxu0 %v1261_v44  ;;  %v1232_v49 = vld [vmem:[#allocation12 + $0x60] sm:$0xff]  ;;  %v1297_v59 = vld [vmem:[#allocation12 + $0x268] sm:$0xff]  ;;  %v1230_v60 = vld [vmem:[#allocation12 + $0x50] sm:$0xff] }
 0x38a   : > { %1329 = vmatpush1.msra.mxu1 %v1247_v35  ;;  %1913 = vmatprep.subr.mxu0 %v1306_v46  ;;  %v1249_v61 = vld [vmem:[#allocation12 + $0xe8] sm:$0xff]  ;;  %v1294_v63 = vld [vmem:[#allocation12 + $0x250] sm:$0xff]  ;;  %v1227_v0 = vld [vmem:[#allocation12 + $0x38] sm:$0xff] }
 0x38b   : > { %1330 = vmatprep.subr.mxu1 %v1245_v38  ;;  %1914 = vmatpush3.msra.mxu0 %v1258_v50  ;;  %v1229_v62 = vld [vmem:[#allocation12 + $0x48] sm:$0xff]  ;;  %v1246_v1 = vld [vmem:[#allocation12 + $0xd0] sm:$0xff]  ;;  %v1291_v48 = vld [vmem:[#allocation12 + $0x238] sm:$0xff] }
 0x38c   : > { %1331 = vmatpush1.msra.mxu1 %v1244_v40  ;;  %1915 = vmatprep.subr.mxu0 %v1303_v52  ;;  %v1226_v2 = vld [vmem:[#allocation12 + $0x30] sm:$0xff]  ;;  %v1224_v3 = vld [vmem:[#allocation12 + $0x20] sm:$0xff]  ;;  %v1243_v4 = vld [vmem:[#allocation12 + $0xb8] sm:$0xff] }
 0x38d   : > { %1332 = vmatprep.subr.mxu1 %v1242_v43  ;;  %1916 = vmatpush3.msra.mxu0 %v1255_v54  ;;  %v1223_v5 = vld [vmem:[#allocation12 + $0x18] sm:$0xff]  ;;  %v1288_v6 = vld [vmem:[#allocation12 + $0x220] sm:$0xff]  ;;  %v1221_v7 = vld [vmem:[#allocation12 + $0x8] sm:$0xff] }
 0x38e   : > { %1333 = vmatpush1.msra.mxu1 %v1241_v45  ;;  %1917 = vmatprep.subr.mxu0 %v1300_v56  ;;  %v1240_v8 = vld [vmem:[#allocation12 + $0xa0] sm:$0xff]  ;;  %v1285_v10 = vld [vmem:[#allocation12 + $0x208] sm:$0xff]  ;;  %v1314_v11 = vld [vmem:[#allocation12 + $0x2f0] sm:$0xff] }
 0x38f   : > { %1334 = vmatprep.subr.mxu1 %v1239_v47  ;;  %1918 = vmatpush3.msra.mxu0 %v1252_v58  ;;  %v1220_v9 = vld [vmem:[#allocation12] sm:$0xff]  ;;  %v1237_v12 = vld [vmem:[#allocation12 + $0x88] sm:$0xff]  ;;  %v1282_v14 = vld [vmem:[#allocation12 + $0x1f0] sm:$0xff]  ;;  %v1193_v58 = vlaneseq }
 0x390   : > { %1335 = vmatpush1.msra.mxu1 %v1238_v51  ;;  %1919 = vmatprep.subr.mxu0 %v1297_v59  ;;  %v1313_v13 = vld [vmem:[#allocation12 + $0x2e8] sm:$0xff]  ;;  %v1311_v15 = vld [vmem:[#allocation12 + $0x2d8] sm:$0xff]  ;;  %v1234_v17 = vld [vmem:[#allocation12 + $0x70] sm:$0xff] }
 0x391   : > { %1336 = vmatprep.subr.mxu1 %v1236_v53  ;;  %1920 = vmatpush3.msra.mxu0 %v1249_v61  ;;  %v1310_v18 = vld [vmem:[#allocation12 + $0x2d0] sm:$0xff]  ;;  %v1308_v19 = vld [vmem:[#allocation12 + $0x2c0] sm:$0xff]  ;;  %v1307_v20 = vld [vmem:[#allocation12 + $0x2b8] sm:$0xff] }
 0x392   : > { %1337 = vmatpush1.msra.mxu1 %v1235_v55  ;;  %1921 = vmatprep.subr.mxu0 %v1294_v63  ;;  %v1305_v21 = vld [vmem:[#allocation12 + $0x2a8] sm:$0xff]  ;;  %v1304_v22 = vld [vmem:[#allocation12 + $0x2a0] sm:$0xff]  ;;  %v1302_v23 = vld [vmem:[#allocation12 + $0x290] sm:$0xff] }
 0x393   : > { %1338 = vmatprep.subr.mxu1 %v1233_v57  ;;  %1922 = vmatpush3.msra.mxu0 %v1246_v1  ;;  %v1301_v24 = vld [vmem:[#allocation12 + $0x288] sm:$0xff]  ;;  %v1299_v25 = vld [vmem:[#allocation12 + $0x278] sm:$0xff]  ;;  %v1298_v26 = vld [vmem:[#allocation12 + $0x270] sm:$0xff] }
 0x394   : > { %1339 = vmatpush1.msra.mxu1 %v1232_v49  ;;  %1923 = vmatprep.subr.mxu0 %v1291_v48  ;;  %v1296_v27 = vld [vmem:[#allocation12 + $0x260] sm:$0xff]  ;;  %v1295_v28 = vld [vmem:[#allocation12 + $0x258] sm:$0xff]  ;;  %v1293_v29 = vld [vmem:[#allocation12 + $0x248] sm:$0xff]  ;;  %v2749_v49 = vshrl.u32 %v1193_v58, 7 }
 0x395   : > { %1340 = vmatprep.subr.mxu1 %v1230_v60  ;;  %1924 = vmatpush3.msra.mxu0 %v1243_v4  ;;  %v1292_v30 = vld [vmem:[#allocation12 + $0x240] sm:$0xff]  ;;  %v1290_v31 = vld [vmem:[#allocation12 + $0x230] sm:$0xff]  ;;  %v1289_v32 = vld [vmem:[#allocation12 + $0x228] sm:$0xff] }
 0x396   : > { %1341 = vmatpush1.msra.mxu1 %v1229_v62  ;;  %1925 = vmatprep.subr.mxu0 %v1288_v6  ;;  %v1287_v33 = vld [vmem:[#allocation12 + $0x218] sm:$0xff]  ;;  %v1286_v34 = vld [vmem:[#allocation12 + $0x210] sm:$0xff]  ;;  %v1284_v35 = vld [vmem:[#allocation12 + $0x200] sm:$0xff]  ;;  %v2752_v59 = vsub.s32 0, %v2749_v49  ;;  %v2755_v61 = vsub.s32 1, %v2749_v49 }
 0x397   : > { %1342 = vmatprep.subr.mxu1 %v1227_v0  ;;  %1926 = vmatpush3.msra.mxu0 %v1240_v8  ;;  %v1283_v36 = vld [vmem:[#allocation12 + $0x1f8] sm:$0xff]  ;;  %v1281_v37 = vld [vmem:[#allocation12 + $0x1e8] sm:$0xff]  ;;  %v1280_v38 = vld [vmem:[#allocation12 + $0x1e0] sm:$0xff] }
 0x398   : > { %1343 = vmatpush1.msra.mxu1 %v1226_v2  ;;  %1927 = vmatprep.subr.mxu0 %v1285_v10  ;;  %v1278_v39 = vld [vmem:[#allocation12 + $0x1d0] sm:$0xff]  ;;  %v1279_v40 = vld [vmem:[#allocation12 + $0x1d8] sm:$0xff]  ;;  %v1277_v41 = vld [vmem:[#allocation12 + $0x1c8] sm:$0xff] }
 0x399   : > { %1344 = vmatprep.subr.mxu1 %v1224_v3  ;;  %1928 = vmatpush3.msra.mxu0 %v1237_v12  ;;  %v1231_v42 = vld [vmem:[#allocation12 + $0x58] sm:$0xff]  ;;  %v1276_v44 = vld [vmem:[#allocation12 + $0x1c0] sm:$0xff]  ;;  %v1274_v45 = vld [vmem:[#allocation12 + $0x1b0] sm:$0xff] }
 0x39a   : > { %1345 = vmatpush1.msra.mxu1 %v1223_v5  ;;  %1929 = vmatprep.subr.mxu0 %v1282_v14  ;;  %v1275_v43 = vld [vmem:[#allocation12 + $0x1b8] sm:$0xff]  ;;  %v1228_v46 = vld [vmem:[#allocation12 + $0x40] sm:$0xff]  ;;  %v1273_v50 = vld [vmem:[#allocation12 + $0x1a8] sm:$0xff] }
 0x39b   : > { %1346 = vmatprep.subr.mxu1 %v1221_v7  ;;  %1930 = vmatpush3.msra.mxu0 %v1234_v17  ;;  %v1272_v47 = vld [vmem:[#allocation12 + $0x1a0] sm:$0xff]  ;;  %v1271_v51 = vld [vmem:[#allocation12 + $0x198] sm:$0xff]  ;;  %v1225_v52 = vld [vmem:[#allocation12 + $0x28] sm:$0xff] }
 0x39c   : > { %1347 = vmatpush1.msra.mxu1 %v1220_v9  ;;  %1931 = vmatprep.subr.mxu0 %v1279_v40  ;;  %v1269_v53 = vld [vmem:[#allocation12 + $0x188] sm:$0xff]  ;;  %v1270_v54 = vld [vmem:[#allocation12 + $0x190] sm:$0xff]  ;;  %v1268_v55 = vld [vmem:[#allocation12 + $0x180] sm:$0xff] }
 0x39d   : > { %1348 = vmatprep.subr.mxu1 %v1314_v11  ;;  %1932 = vmatpush3.msra.mxu0 %v1231_v42  ;;  %v1222_v56 = vld [vmem:[#allocation12 + $0x10] sm:$0xff]  ;;  %v1530_v57 = vld [vmem:[#allocation13 + $0xf8] sm:$0xff]  ;;  %v1512_v14 = vld [vmem:[#allocation13 + $0x68] sm:$0xff] }
 0x39e   : > { %1349 = vmatpush2.msra.mxu1 %v1313_v13  ;;  %1933 = vmatprep.subr.mxu0 %v1276_v44  ;;  %v1191_v60 = vld [vmem:[#allocation2 + $0x2] ss:$4 sm:$0x3]  ;;  %v1206_v63 = vld [vmem:[#allocation2 + $0x3] ss:$4 sm:$0x3] }
 0x39f   : > { %1350 = vmatprep.subr.mxu1 %v1311_v15  ;;  %1934 = vmatpush3.msra.mxu0 %v1228_v46  ;;  %v1196_v62 = vrot.slane %v1191_v60, %v2752_v59  ;;  %v1200_v0 = vrot.slane %v1191_v60, %v2755_v61  ;;  %v1215_v2 = vrot.slane %v1206_v63, %v2755_v61  ;;  %v1514_v8 = vld [vmem:[#allocation13 + $0x78] sm:$0xff]  ;;  %v1529_v10 = vld [vmem:[#allocation13 + $0xf0] sm:$0xff]  ;;  %v1528_v13 = vld [vmem:[#allocation13 + $0xe8] sm:$0xff]  ;;  %v1470_v60 = vsub.s32 2, %v2749_v49 }
 0x3a0   : > { %1351 = vmatpush2.msra.mxu1 %v1310_v18  ;;  %1935 = vmatprep.subr.mxu0 %v1273_v50  ;;  %v1211_v3 = vrot.slane %v1206_v63, %v2752_v59  ;;  %v1546_v9 = vld [vmem:[#allocation13 + $0x178] sm:$0xff]  ;;  %v1513_v11 = vld [vmem:[#allocation13 + $0x70] sm:$0xff]  ;;  %v1544_v15 = vld [vmem:[#allocation13 + $0x168] sm:$0xff] }
 0x3a1   : > { %1352 = vmatprep.subr.mxu1 %v1308_v19  ;;  %1936 = vmatpush3.msra.mxu0 %v1225_v52  ;;  %v1545_v12 = vld [vmem:[#allocation13 + $0x170] sm:$0xff]  ;;  %v1527_v17 = vld [vmem:[#allocation13 + $0xe0] sm:$0xff]  ;;  %v1536_v40 = vld [vmem:[#allocation13 + $0x128] sm:$0xff] }
 0x3a2   : > { %1353 = vmatpush2.msra.mxu1 %v1307_v20  ;;  %1937 = vmatprep.subr.mxu0 %v1270_v54  ;;  %v1511_v18 = vld [vmem:[#allocation13 + $0x60] sm:$0xff]  ;;  %v1526_v20 = vld [vmem:[#allocation13 + $0xd8] sm:$0xff]  ;;  %v1517_v46 = vld [vmem:[#allocation13 + $0x90] sm:$0xff] }
 0x3a3   : > { %1354 = vmatprep.subr.mxu1 %v1305_v21  ;;  %1938 = vmatpush3.msra.mxu0 %v1222_v56  ;;  %v1543_v19 = vld [vmem:[#allocation13 + $0x160] sm:$0xff]  ;;  %v1510_v21 = vld [vmem:[#allocation13 + $0x58] sm:$0xff]  ;;  %v1501_v50 = vld [vmem:[#allocation13 + $0x10] sm:$0xff] }
 0x3a4   : > { %1355 = vmatpush2.msra.mxu1 %v1304_v22  ;;  %1942 = vmatprep.subr.mxu0 %v1530_v57  ;;  %v1542_v22 = vld [vmem:[#allocation13 + $0x158] sm:$0xff]  ;;  %v1503_v42 = vld [vmem:[#allocation13 + $0x20] sm:$0xff]  ;;  %v1533_v52 = vld [vmem:[#allocation13 + $0x110] sm:$0xff] }
 0x3a5   : > { %1356 = vmatprep.subr.mxu1 %v1302_v23  ;;  %v1525_v23 = vld [vmem:[#allocation13 + $0xd0] sm:$0xff]  ;;  %v1535_v44 = vld [vmem:[#allocation13 + $0x120] sm:$0xff] }
 0x3a6   : > { %1357 = vmatpush2.msra.mxu1 %v1301_v24  ;;  %v1509_v24 = vld [vmem:[#allocation13 + $0x50] sm:$0xff]  ;;  %v1515_v54 = vld [vmem:[#allocation13 + $0x80] sm:$0xff] }
 0x3a7   : > { %1358 = vmatprep.subr.mxu1 %v1299_v25  ;;  %v1541_v25 = vld [vmem:[#allocation13 + $0x150] sm:$0xff]  ;;  %v1499_v56 = vld [vmem:[#allocation13] sm:$0xff] }
 0x3a8   : > { %1359 = vmatpush2.msra.mxu1 %v1298_v26  ;;  %v1524_v26 = vld [vmem:[#allocation13 + $0xc8] sm:$0xff]  ;;  %v1531_v57 = vld [vmem:[#allocation13 + $0x100] sm:$0xff] }
 0x3a9   : > { %1360 = vmatprep.subr.mxu1 %v1296_v27  ;;  %v1508_v27 = vld [vmem:[#allocation13 + $0x48] sm:$0xff] }
 0x3aa   : > { %1361 = vmatpush2.msra.mxu1 %v1295_v28  ;;  %v1540_v28 = vld [vmem:[#allocation13 + $0x148] sm:$0xff] }
 0x3ab   : > { %1362 = vmatprep.subr.mxu1 %v1293_v29  ;;  %v1523_v29 = vld [vmem:[#allocation13 + $0xc0] sm:$0xff] }
 0x3ac   : > { %1363 = vmatpush2.msra.mxu1 %v1292_v30  ;;  %v1507_v30 = vld [vmem:[#allocation13 + $0x40] sm:$0xff] }
 0x3ad   : > { %1364 = vmatprep.subr.mxu1 %v1290_v31  ;;  %v1539_v31 = vld [vmem:[#allocation13 + $0x140] sm:$0xff] }
 0x3ae   : > { %1365 = vmatpush2.msra.mxu1 %v1289_v32  ;;  %v1522_v32 = vld [vmem:[#allocation13 + $0xb8] sm:$0xff]  ;;  %v1458_v58 = vld [vmem:[#allocation3 + $0x2] ss:$4 sm:$0x7] }
 0x3af   : > { %1366 = vmatprep.subr.mxu1 %v1287_v33  ;;  %v1506_v33 = vld [vmem:[#allocation13 + $0x38] sm:$0xff]  ;;  %v1479_v63 = vld [vmem:[#allocation3 + $0x3] ss:$4 sm:$0x7] }
 0x3b0   : > { %1367 = vmatpush2.msra.mxu1 %v1286_v34  ;;  %v1538_v34 = vld [vmem:[#allocation13 + $0x138] sm:$0xff] }
 0x3b1   : > { %1368 = vmatprep.subr.mxu1 %v1284_v35  ;;  %v1521_v35 = vld [vmem:[#allocation13 + $0xb0] sm:$0xff] }
 0x3b2   : > { %1369 = vmatpush2.msra.mxu1 %v1283_v36  ;;  %v1505_v36 = vld [vmem:[#allocation13 + $0x30] sm:$0xff] }
 0x3b3   : > { %1370 = vmatprep.subr.mxu1 %v1281_v37  ;;  %v1537_v37 = vld [vmem:[#allocation13 + $0x130] sm:$0xff] }
 0x3b4   : > { %1371 = vmatpush2.msra.mxu1 %v1280_v38  ;;  %v1520_v38 = vld [vmem:[#allocation13 + $0xa8] sm:$0xff] }
 0x3b5   : > { %1372 = vmatprep.subr.mxu1 %v1278_v39  ;;  %v1504_v39 = vld [vmem:[#allocation13 + $0x28] sm:$0xff] }
 0x3b6   : > { %1373 = vmatpush2.msra.mxu1 %v1277_v41  ;;  %v1519_v41 = vld [vmem:[#allocation13 + $0xa0] sm:$0xff] }
 0x3b7   : > { %1374 = vmatprep.subr.mxu1 %v1275_v43  ;;  %v1518_v43 = vld [vmem:[#allocation13 + $0x98] sm:$0xff] }
 0x3b8   : > { %1375 = vmatpush2.msra.mxu1 %v1274_v45  ;;  %v1502_v45 = vld [vmem:[#allocation13 + $0x18] sm:$0xff] }
 0x3b9   : > { %1376 = vmatprep.subr.mxu1 %v1272_v47  ;;  %v1534_v47 = vld [vmem:[#allocation13 + $0x118] sm:$0xff] }
 0x3ba   : > { %1377 = vmatpush2.msra.mxu1 %v1271_v51  ;;  %v1516_v51 = vld [vmem:[#allocation13 + $0x88] sm:$0xff] }
 0x3bb   : > { %1378 = vmatprep.subr.mxu1 %v1269_v53  ;;  %v1500_v53 = vld [vmem:[#allocation13 + $0x8] sm:$0xff] }
 0x3bc   : > { %1379 = vmatpush2.msra.mxu1 %v1268_v55  ;;  %v1532_v55 = vld [vmem:[#allocation13 + $0x108] sm:$0xff] }
 0x3bd   : > { %1994 = vmatprep.subr.mxu1 %v2462_v16 }
 0x443   : > { %v1185_v1 = vpop.f32.mrf.mxu0 }
 0x444   : > { %v1203_v48 = vmul.f32 %v1196_v62, %v1185_v1  ;;  %v1463_v62 = vrot.slane %v1458_v58, %v2752_v59 }
 0x445   : > { %v1187_v4 = vpop.f32.mrf.mxu0 }
 0x446   : > { %v1204_v5 = vmul.f32 %v1200_v0, %v1187_v4  ;;  %v1218_v7 = vadd.f32 %v1211_v3, %v1203_v48  ;;  %v1467_v0 = vrot.slane %v1458_v58, %v2755_v61  ;;  %v1488_v48 = vrot.slane %v1479_v63, %v2755_v61  ;;  %v1867_v61 = vld [vmem:[%s2840_s8] ss:$0 sm:$0xff] }
 0x447   : > { %v1471_v3 = vrot.slane %v1458_v58, %v1470_v60 }
 0x448   : > { %v1219_v6 = vadd.f32 %v1215_v2, %v1204_v5  ;;  %v1484_v5 = vrot.slane %v1479_v63, %v2752_v59 }
 0x44a   : > { %1380 = vmatprep.mubr.f32.mxu1 %v1219_v6  ;;  %1451 = vmatprep.mubr.f32.mxu0 %v1219_v6 }
 0x44b   : > { %1381 = vmatmul.mubr.f32.vlgmr.msra.gmra.mxu1 %v1218_v7  ;;  %1452 = vmatmul.mubr.f32.vlgmr.msra.gmra.mxu0 %v1218_v7 }
 0x44c   : > { %1943 = vmatpush3.msra.mxu0 %v1514_v8  ;;  %1995 = vmatpush3.msra.mxu1 %v1546_v9  ;;  %v1492_v9 = vrot.slane %v1479_v63, %v1470_v60 }
 0x44d   : > { %1944 = vmatprep.subr.mxu0 %v1529_v10  ;;  %1996 = vmatprep.subr.mxu1 %v2462_v16 }
 0x44e   : > { %1945 = vmatpush3.msra.mxu0 %v1513_v11  ;;  %1997 = vmatpush3.msra.mxu1 %v1545_v12 }
 0x44f   : > { %1946 = vmatprep.subr.mxu0 %v1528_v13  ;;  %1998 = vmatprep.subr.mxu1 %v2462_v16 }
 0x450   : > { %1947 = vmatpush3.msra.mxu0 %v1512_v14  ;;  %1999 = vmatpush3.msra.mxu1 %v1544_v15 }
 0x451   : > { %1948 = vmatprep.subr.mxu0 %v1527_v17  ;;  %2000 = vmatprep.subr.mxu1 %v2462_v16 }
 0x452   : > { %1949 = vmatpush3.msra.mxu0 %v1511_v18  ;;  %2001 = vmatpush3.msra.mxu1 %v1543_v19 }
 0x453   : > { %1950 = vmatprep.subr.mxu0 %v1526_v20  ;;  %2002 = vmatprep.subr.mxu1 %v2462_v16 }
 0x454   : > { %1951 = vmatpush3.msra.mxu0 %v1510_v21  ;;  %2003 = vmatpush3.msra.mxu1 %v1542_v22 }
 0x455   : > { %1952 = vmatprep.subr.mxu0 %v1525_v23  ;;  %2004 = vmatprep.subr.mxu1 %v2462_v16 }
 0x456   : > { %1953 = vmatpush3.msra.mxu0 %v1509_v24  ;;  %2005 = vmatpush3.msra.mxu1 %v1541_v25 }
 0x457   : > { %1954 = vmatprep.subr.mxu0 %v1524_v26  ;;  %2006 = vmatprep.subr.mxu1 %v2462_v16 }
 0x458   : > { %1955 = vmatpush3.msra.mxu0 %v1508_v27  ;;  %2007 = vmatpush3.msra.mxu1 %v1540_v28 }
 0x459   : > { %1956 = vmatprep.subr.mxu0 %v1523_v29  ;;  %2008 = vmatprep.subr.mxu1 %v2462_v16 }
 0x45a   : > { %1957 = vmatpush3.msra.mxu0 %v1507_v30  ;;  %2009 = vmatpush3.msra.mxu1 %v1539_v31 }
 0x45b   : > { %1958 = vmatprep.subr.mxu0 %v1522_v32  ;;  %2010 = vmatprep.subr.mxu1 %v2462_v16 }
 0x45c   : > { %1959 = vmatpush3.msra.mxu0 %v1506_v33  ;;  %2011 = vmatpush3.msra.mxu1 %v1538_v34 }
 0x45d   : > { %1960 = vmatprep.subr.mxu0 %v1521_v35  ;;  %2012 = vmatprep.subr.mxu1 %v2462_v16 }
 0x45e   : > { %1961 = vmatpush3.msra.mxu0 %v1505_v36  ;;  %2013 = vmatpush3.msra.mxu1 %v1537_v37 }
 0x45f   : > { %1962 = vmatprep.subr.mxu0 %v1520_v38  ;;  %2014 = vmatprep.subr.mxu1 %v2462_v16 }
 0x460   : > { %1963 = vmatpush3.msra.mxu0 %v1504_v39  ;;  %2015 = vmatpush3.msra.mxu1 %v1536_v40 }
 0x461   : > { %1964 = vmatprep.subr.mxu0 %v1519_v41  ;;  %2016 = vmatprep.subr.mxu1 %v2462_v16 }
 0x462   : > { %1965 = vmatpush3.msra.mxu0 %v1503_v42  ;;  %2017 = vmatpush3.msra.mxu1 %v1535_v44 }
 0x463   : > { %1966 = vmatprep.subr.mxu0 %v1518_v43  ;;  %2018 = vmatprep.subr.mxu1 %v2462_v16 }
 0x464   : > { %1967 = vmatpush3.msra.mxu0 %v1502_v45  ;;  %2019 = vmatpush3.msra.mxu1 %v1534_v47 }
 0x465   : > { %1968 = vmatprep.subr.mxu0 %v1517_v46  ;;  %2020 = vmatprep.subr.mxu1 %v2462_v16 }
 0x466   : > { %1969 = vmatpush3.msra.mxu0 %v1501_v50  ;;  %2021 = vmatpush3.msra.mxu1 %v1533_v52 }
 0x467   : > { %1970 = vmatprep.subr.mxu0 %v1516_v51  ;;  %2022 = vmatprep.subr.mxu1 %v2462_v16 }
 0x468   : > { %1971 = vmatpush3.msra.mxu0 %v1500_v53  ;;  %2023 = vmatpush3.msra.mxu1 %v1532_v55 }
 0x469   : > { %1972 = vmatprep.subr.mxu0 %v1515_v54  ;;  %2024 = vmatprep.subr.mxu1 %v2462_v16 }
 0x46a   : > { %1973 = vmatpush3.msra.mxu0 %v1499_v56  ;;  %2025 = vmatpush3.msra.mxu1 %v1531_v57 }
 0x46b   : > { %2026 = vmatprep.mubr.msk.f32.mxu1 %vm2463_vm5, %v2462_v16 }
 0x50b   : > { %v1382_v1 = vpop.f32.mrf.mxu1  ;;  %v1939_v2 = vpop.f32.mrf.mxu0 }
 0x50c   : > { %v1475_v4 = vmul.f32 %v1463_v62, %v1382_v1 }
 0x50d   : > { %v1384_v6 = vpop.f32.mrf.mxu1  ;;  %v1940_v7 = vpop.f32.mrf.mxu0 }
 0x50e   : > { %v1476_v8 = vmul.f32 %v1467_v0, %v1384_v6  ;;  %v1941_v16 = vadd.f32 %v1940_v7, %v1939_v2  ;;  %v1496_v11 = vadd.f32 %v1484_v5, %v1475_v4 }
 0x510   : > { %v1497_v49 = vadd.f32 %v1488_v48, %v1476_v8  ;;  %v1477_v10 = vmul.f32 %v1941_v16, %v1471_v3 }
 0x512   : > { %v1498_v12 = vadd.f32 %v1492_v9, %v1477_v10  ;;  %1618 = vmatprep.mubr.f32.mxu0 %v1497_v49 }
 0x513   : > { %1619 = vmatmul.mubr.f32.vlgmr.msra.gmra.mxu0 %v1496_v11 }
 0x514   : > { %2027 = vmatmul.mubr.f32.vlgmr.msra.gmra.mxu1 %v1498_v12 }
 0x5d3   : > { %v1974_v13 = vpop.f32.mrf.mxu0 }
 0x5d4   : > { %v1690_v14 = vpop.f32.mrf.mxu1 }
 0x5d5   : > { %v1975_v59 = vpop.f32.mrf.mxu0 }
 0x5d6   : > { %v1976_v15 = vadd.f32 %v1975_v59, %v1974_v13  ;;  %v2028_v17 = vpop.f32.mrf.mxu1 }
 0x5d8   : > { %v1621_v18 = vadd.f32 %v1976_v15, %v1867_v61 }
 0x5da   : > { %v1691_v19 = vadd.f32 %v1690_v14, %v1621_v18 }
 0x5dc   : > { %1694 = vst [vmem:[%s2703_s2] sm:$0xff] %v1691_v19 }
 0x5dd PF: > { %s1869_s28 = sshll.u32 %s2426_s12, 7  ;;  %s2880_s26 = sld [smem:[#allocation29_spill]] }
 0x5de   : > { %s1709_s20 = sshll.u32 %s2703_s2, 4  ;;  %s1696_s1 = scalar_lea.sflag [#allocation6], %s2681_s4  ;;  %s1710_s20 = int_to_ptr.vmem [resolvable:$true] %s1709_s20 }
 0x5df   : > { %s2334_s25 = scalar_lea.vmem %s1710_s20, 128  ;;  %s2464_s23 = smov [#allocation15]  }
 0x5e0   : > { %p2335_p5 = scmp.ne.s32.totalorder %s1710_s20, %s2334_s25  ;;  %s2338_s24 = sshll.u32 %s2464_s23, 4  ;;  %s2339_s24 = int_to_ptr.vmem [resolvable:$false] %s2338_s24 }
 0x5e1   : > { %s2340_s3 = scalar_lea.vmem %s2339_s24, 256  ;;  %p2341_p2 = scmp.lt.s32.totalorder %s1710_s20, %s2339_s24 }
 0x5e2   : > { %p2336_p1 = pnand %p2335_p5, %p2654_p0  ;;  %p2342_p3 = scmp.lt.s32.totalorder %s2340_s3, %s2334_s25 }
 0x5e3   : > { %s1707_s17 = scalar_lea.hbm %s2880_s26, %s1869_s28 }
 0x5e4   : > { %p2337_p12 = pneg %p2336_p1  ;;  %p2343_p13 = por %p2342_p3, %p2341_p2 }
 0x5e6   : > { %p2344_p6 = pnand %p2343_p13, %p2337_p12 }
 0x5e8   : > { %2347 = shalt.err (!%p2344_p6)
}
 0x5e9   : > { %s2348_s12 = scalar_lea.hbm %s1707_s17, 128  ;;  %s2352_s7 = scalar_lea.hbm %s2880_s26, 256 }
 0x5ea   : > { %p2349_p7 = scmp.ne.s32.totalorder %s1707_s17, %s2348_s12  ;;  %p2353_p9 = scmp.lt.s32.totalorder %s1707_s17, %s2880_s26 }
 0x5eb   : > { %p2354_p11 = scmp.lt.s32.totalorder %s2352_s7, %s2348_s12 }
 0x5ec   : > { %p2350_p8 = pnand %p2349_p7, %p2654_p0 }
 0x5ed   : > { %p2355_p5 = por %p2354_p11, %p2353_p9 }
 0x5ee   : > { %p2351_p10 = pneg %p2350_p8 }
 0x5f0   : > { %p2356_p1 = pnand %p2355_p5, %p2351_p10 }
 0x5f2   : > { %2359 = shalt.err (!%p2356_p1)
}
 0x5f3   : > { %2051 = dma.vmem_to_hbm [thread:$0]  (%p2654_p0), %s1710_s20, 128, %s1707_s17, %s1696_s1  }
 0x5f4 PF: > { %p2088_p12 = scmp.ge.s32.totalorder %s2442_s16, 2  ;;  %s1721_s13 = sand.u32 1, %s2414_s30  }
 0x5f5   : > { %s1722_s19 = scalar_lea.sflag [#allocation6], %s1721_s13 }
 0x5f6   : > { %p2074_p2 = pnand %p2088_p12, %p2661_p4 }
 0x5f8   : > { %p2075_p3 = pneg %p2074_p2 }
 0x5fa   : > { %2409 = dma.done.wait (%p2075_p3), %s1722_s19, 128  }
 0x5fb   : > { %2411 = vsyncadd (%p2075_p3), %s1722_s19, 4294967168  ;;  %s28_s16 = sadd.s32 1, %s2442_s16   ;;  %s2881_s13 = sld [smem:[#allocation21_spill]] }
 0x5fc   : > { %p25_p13 = scmp.ge.s32.totalorder %s28_s16, 8   ;;  %s2882_s27 = sld [smem:[#allocation22_spill]] }
 0x5fd   : > { %s2883_s15 = sld [smem:[#allocation23_spill]]  ;;  %s2884_s30 = smov %s2418_s10 }
 0x5fe   : > { %s2885_s10 = smov %s2422_s11  ;;  %s2886_s11 = smov %s2643_s21 }
 0x5ff   : > { %s2887_s12 = smov %s2434_s14  ;;  %27 = sbr.rel (!%p25_p13) target bundleno = 17 (0x11), region = 161 }
 0x602   : > { %s2888_s14 = smov %s2882_s27 }
 0x604   :  { %1727 = vsyncpa [#allocation5], 1 }
 0x605   :  { %1729 = vsyncpa [#allocation5 + $0x1], 1 }
 0x606   :  { %1730 = vsyncpa [#allocation8], 1 }
 0x607   :  { %1731 = vsyncpa [#allocation11], 1 }
 0x608   :  { %1732 = vsyncpa [#allocation14], 1 }
 0x609   :  { %1733 = vsyncpa [#allocation6], 1 }
 0x60a   :  { %1735 = vsyncpa [#allocation6 + $0x1], 1 }

</bundles_post_ra>
